<compile_context>
chip_gen: v7x
topology: tpu7x:2x2x1
jax: 0.10.0
libtpu: 0.0.40
codegen_flags: <defaults>
</compile_context>

<pallas_src>
import functools

import jax
import jax.numpy as jnp
from jax.experimental import pallas as pl
from jax.experimental.pallas import tpu as pltpu


# --------------------------------------------------------------------------- #
# small helpers
# --------------------------------------------------------------------------- #
def _round_up(x, m):
    return (x + m - 1) // m * m


def _nbytes(shape, dtype):
    n = 1
    for d in shape:
        n *= d
    return n * jnp.dtype(dtype).itemsize


def _vmem_limit_bytes():
    """~75% of the physical VMEM of the local chip (conservative fallback otherwise)."""
    try:
        cap = int(pltpu.get_tpu_info().vmem_capacity_bytes)
    except Exception:
        cap = 64 * 1024 * 1024
    return int(cap * 3 // 4)


# --------------------------------------------------------------------------- #
# fused ResidualBlock kernel
# --------------------------------------------------------------------------- #
def _resblock_kernel(*refs, taps1, res_src, m_out, pitch, wo, use_wsc):
    """Fused conv3x3(+BN1)+ReLU -> conv3x3(+BN2) + shortcut -> ReLU, one image per grid step.

    refs (in order):
      x_ref:   (1, Mx, Cin_p)        bf16  flattened, zero-padded (stride-parity-split) image
      w1_ref:  (9*Cin_p, Cout_p)     bf16  conv1 weights (BN1 scale folded), tap-concat layout
      b1_ref:  (1, Cout_p)           f32   fused BN1 bias
      w2_ref:  (9*Cout_p, Cout_p)    bf16  conv2 weights (BN2 scale folded)
      b2_ref:  (1, Cout_p)           f32   fused BN2 bias
      wsc_ref: (Cin_p, Cout_p)       bf16  (only if use_wsc) 1x1 shortcut / channel-pad eye
      o_ref:   (1, M, Cout_p)              M = Ho*P; flat columns >= Wo of each row are garbage
      h_ref:   ((Ho+2)*P+16, Cout_p) f32   VMEM scratch: zero-padded flattened out1
    """
    if use_wsc:
        x_ref, w1_ref, b1_ref, w2_ref, b2_ref, wsc_ref, o_ref, h_ref = refs
    else:
        x_ref, w1_ref, b1_ref, w2_ref, b2_ref, o_ref, h_ref = refs

    P = pitch
    M = m_out
    ho = M // P
    cout_p = h_ref.shape[1]

    # Zero the leading (top-halo) and trailing (bottom-halo) bands of the out1 scratch.
    # Both offsets/lengths are multiples of 8 -> aligned stores. The interior is fully
    # overwritten by conv1 below, so no full-scratch clear is needed.
    zeros_band = jnp.zeros((P + 8, cout_p), h_ref.dtype)
    h_ref[pl.ds(0, P + 8), :] = zeros_band
    h_ref[pl.ds((ho + 1) * P + 8, P + 8), :] = zeros_band

    # ---- conv1 + BN1 + ReLU: all 9 taps as ONE MXU dot (K = 9*Cin_p) ----------------------
    lhs1 = jnp.concatenate([x_ref[0, pl.ds(off, M), :] for off in taps1], axis=-1)
    acc1 = jnp.dot(lhs1, w1_ref[...], preferred_element_type=jnp.float32)
    acc1 = jnp.maximum(acc1 + b1_ref[...], 0.0)

    # Zero the garbage columns (flat col >= Wo): they become out1's zero halo for conv2.
    col = jax.lax.broadcasted_iota(jnp.int32, (M, 1), 0) % P
    acc1 = jnp.where(col < wo, acc1, 0.0)

    # Aligned write of out1 into the interior of the padded scratch (stays in VMEM, f32).
    h_ref[pl.ds(P + 8, M), :] = acc1

    # ---- conv2 + BN2: again a single K = 9*Cout_p dot from the VMEM scratch ---------------
    lhs2 = jnp.concatenate(
        [h_ref[pl.ds(dh * P + dw + 7, M), :].astype(jnp.bfloat16)
         for dh in range(3) for dw in range(3)], axis=-1)
    acc2 = jnp.dot(lhs2, w2_ref[...], preferred_element_type=jnp.float32)
    acc2 = acc2 + b2_ref[...]

    # ---- shortcut: read straight from the x block already resident in VMEM ----------------
    res = x_ref[0, pl.ds(res_src, M), :]
    if use_wsc:
        # 1x1 projection (also used as an "eye" matmul when channel paddings differ).
        acc2 = acc2 + jnp.dot(res, wsc_ref[...], preferred_element_type=jnp.float32)
    else:
        # identity shortcut, cin_p == cout_p -> direct add.
        acc2 = acc2 + res.astype(jnp.float32)

    o_ref[0] = jnp.maximum(acc2, 0.0).astype(o_ref.dtype)


# --------------------------------------------------------------------------- #
# parameter preparation (BN folding, padding, bf16 cast)
# --------------------------------------------------------------------------- #
def fold_bn(gamma, beta, mean, var, eps=1e-5):
    scale = gamma / jnp.sqrt(var + eps)
    bias = beta - mean * scale
    return scale, bias


def prep_conv3x3_weight(w_oihw, bn_scale, cin_p, cout_p):
    cout, cin, kh, kw = w_oihw.shape
    w = jnp.transpose(w_oihw, (2, 3, 1, 0)) * bn_scale[None, None, None, :]
    w = jnp.pad(w, ((0, 0), (0, 0), (0, cin_p - cin), (0, cout_p - cout)))
    return w.reshape(kh * kw * cin_p, cout_p).astype(jnp.bfloat16)


def prep_shortcut_weight(w_oihw, cin_p, cout_p):
    cout, cin = w_oihw.shape[0], w_oihw.shape[1]
    w = jnp.transpose(w_oihw[:, :, 0, 0], (1, 0))
    w = jnp.pad(w, ((0, cin_p - cin), (0, cout_p - cout)))
    return w.astype(jnp.bfloat16)


def prep_bias(bias, cout_p):
    return jnp.pad(bias, (0, cout_p - bias.shape[0]))[None, :].astype(jnp.float32)


# --------------------------------------------------------------------------- #
# forward
# --------------------------------------------------------------------------- #
def residual_block_forward(x_nchw, params, stride, in_channels, out_channels):
    """Pallas-backed ResidualBlock forward (inference BN stats). NCHW f32 in/out."""
    s = int(stride)
    x = jnp.transpose(x_nchw, (0, 2, 3, 1)).astype(jnp.float32)      # NHWC
    N, H, W, _ = x.shape
    Ho = (H - 1) // s + 1
    Wo = (W - 1) // s + 1

    # channel padding: lane-dense Cout; Cin padded to 128 only when large enough to pay off
    cin_p = _round_up(in_channels, 128) if in_channels >= 64 else _round_up(in_channels, 8)
    cout_p = _round_up(out_channels, 128)

    P = _round_up(Wo + 2, 8)            # flattened row pitch (input taps, out1 scratch, output)
    Hs = -(-(H + 2) // s)               # rows per stride-parity sub-image of the padded input
    msub = Hs * P
    M = Ho * P                          # flattened output positions (cols >= Wo are garbage)

    # ---- fold BN into conv weights / biases ----
    s1, b1 = fold_bn(params["bn1_gamma"], params["bn1_beta"],
                     params["bn1_mean"], params["bn1_var"])
    s2, b2 = fold_bn(params["bn2_gamma"], params["bn2_beta"],
                     params["bn2_mean"], params["bn2_var"])
    w1 = prep_conv3x3_weight(params["w1"], s1, cin_p, cout_p)       # (9*cin_p, cout_p)
    w2 = prep_conv3x3_weight(params["w2"], s2, cout_p, cout_p)      # (9*cout_p, cout_p)
    b1p = prep_bias(b1, cout_p)
    b2p = prep_bias(b2, cout_p)

    # ---- shortcut weights (no BN on the shortcut, matching the module) ----
    if s != 1 or in_channels != out_channels:
        wsc = prep_shortcut_weight(params["w_shortcut"], cin_p, cout_p)
        use_wsc = True
    elif cin_p != cout_p:
        # identity shortcut but channel paddings differ -> express as a 1x1 "eye" projection
        wsc = jnp.eye(cin_p, cout_p, dtype=jnp.bfloat16)
        use_wsc = True
    else:
        wsc = None
        use_wsc = False

    # ---- zero-pad + flatten the input (stride folded into a parity-split layout) ----
    xp = jnp.pad(x, ((0, 0), (1, s * Hs - H - 1), (1, s * P - W - 1),
                     (0, cin_p - in_channels))).astype(jnp.bfloat16)
    if s == 1:
        n_img = 1
        x_flat = xp.reshape(N, msub, cin_p)
    else:
        n_img = s * s
        xp = xp.reshape(N, Hs, s, P, s, cin_p)
        xp = jnp.transpose(xp, (0, 2, 4, 1, 3, 5))     # (N, rp, cp, r2, c2, C)
        x_flat = xp.reshape(N, n_img * msub, cin_p)
    x_flat = jnp.pad(x_flat, ((0, 0), (0, 8), (0, 0)))  # headroom rows for the last taps
    mx = x_flat.shape[1]

    # per-tap flattened offsets into x_flat (tap order dh*3+dw matches the weight layout)
    taps1 = tuple(((dh % s) * s + (dw % s)) * msub + (dh // s) * P + (dw // s)
                  for dh in range(3) for dw in range(3))
    # shortcut source x[s*ho, s*wo] in the same flattened layout
    res_src = ((1 % s) * s + (1 % s)) * msub + (1 // s) * P + (1 // s)

    inputs = [x_flat, w1, b1p, w2, b2p]
    in_specs = [
        pl.BlockSpec((1, mx, cin_p), lambda n: (n, 0, 0)),
        pl.BlockSpec((9 * cin_p, cout_p), lambda n: (0, 0)),
        pl.BlockSpec((1, cout_p), lambda n: (0, 0)),
        pl.BlockSpec((9 * cout_p, cout_p), lambda n: (0, 0)),
        pl.BlockSpec((1, cout_p), lambda n: (0, 0)),
    ]
    if use_wsc:
        inputs.append(wsc)
        in_specs.append(pl.BlockSpec((cin_p, cout_p), lambda n: (0, 0)))

    kernel = functools.partial(_resblock_kernel, taps1=taps1, res_src=res_src,
                               m_out=M, pitch=P, wo=Wo, use_wsc=use_wsc)

    scratch_rows = (Ho + 2) * P + 16
    out_dtype = jnp.float32

    flops = 2 * N * M * cout_p * (9 * cin_p + 9 * cout_p + (cin_p if use_wsc else 0))
    bytes_accessed = (_nbytes((N, mx, cin_p), jnp.bfloat16)
                      + _nbytes(w1.shape, jnp.bfloat16)
                      + _nbytes(w2.shape, jnp.bfloat16)
                      + 2 * _nbytes((1, cout_p), jnp.float32)
                      + (_nbytes((cin_p, cout_p), jnp.bfloat16) if use_wsc else 0)
                      + _nbytes((N, M, cout_p), out_dtype))

    out_flat = pl.pallas_call(
        kernel,
        out_shape=jax.ShapeDtypeStruct((N, M, cout_p), out_dtype),
        grid=(N,),
        in_specs=in_specs,
        out_specs=pl.BlockSpec((1, M, cout_p), lambda n: (n, 0, 0)),
        scratch_shapes=[pltpu.VMEM((scratch_rows, cout_p), jnp.float32)],
        compiler_params=pltpu.CompilerParams(
            dimension_semantics=("parallel",),
            vmem_limit_bytes=_vmem_limit_bytes()),
        cost_estimate=pl.CostEstimate(flops=int(flops), transcendentals=0,
                                      bytes_accessed=int(bytes_accessed)),
    )(*inputs)

    out = out_flat.reshape(N, Ho, P, cout_p)[:, :, :Wo, :out_channels]
    return jnp.transpose(out, (0, 3, 1, 2))                          # back to NCHW


# --------------------------------------------------------------------------- #
# pure-JAX reference (lax.conv) for correctness checking
# --------------------------------------------------------------------------- #
def residual_block_reference(x_nchw, params, stride, in_channels, out_channels):
    def conv(x, w, s, pad):
        return jax.lax.conv_general_dilated(
            x, w, (s, s), ((pad, pad), (pad, pad)),
            dimension_numbers=("NCHW", "OIHW", "NCHW"))

    def bn(y, g, b, m, v, eps=1e-5):
        g = g[None, :, None, None]; b = b[None, :, None, None]
        m = m[None, :, None, None]; v = v[None, :, None, None]
        return (y - m) / jnp.sqrt(v + eps) * g + b

    if stride != 1 or in_channels != out_channels:
        residual = conv(x_nchw, params["w_shortcut"], stride, 0)
    else:
        residual = x_nchw
    out = conv(x_nchw, params["w1"], stride, 1)
    out = bn(out, params["bn1_gamma"], params["bn1_beta"],
             params["bn1_mean"], params["bn1_var"])
    out = jnp.maximum(out, 0.0)
    out = conv(out, params["w2"], 1, 1)
    out = bn(out, params["bn2_gamma"], params["bn2_beta"],
             params["bn2_mean"], params["bn2_var"])
    out = jnp.maximum(out + residual, 0.0)
    return out


def make_params(key, in_channels, out_channels, stride):
    ks = jax.random.split(key, 8)
    w1_std = (2.0 / (9 * in_channels)) ** 0.5
    w2_std = (2.0 / (9 * out_channels)) ** 0.5
    params = {
        "w1": w1_std * jax.random.normal(ks[0], (out_channels, in_channels, 3, 3),
                                         jnp.float32),
        "w2": w2_std * jax.random.normal(ks[1], (out_channels, out_channels, 3, 3),
                                         jnp.float32),
        "bn1_gamma": 1.0 + 0.1 * jax.random.normal(ks[2], (out_channels,), jnp.float32),
        "bn1_beta": 0.1 * jax.random.normal(ks[3], (out_channels,), jnp.float32),
        "bn1_mean": 0.05 * jax.random.normal(ks[4], (out_channels,), jnp.float32),
        "bn1_var": jnp.abs(jax.random.normal(ks[5], (out_channels,), jnp.float32)) + 0.5,
        "bn2_gamma": 1.0 + 0.1 * jax.random.normal(ks[6], (out_channels,), jnp.float32),
        "bn2_beta": 0.1 * jax.random.normal(ks[7], (out_channels,), jnp.float32),
        "bn2_mean": jnp.zeros((out_channels,), jnp.float32),
        "bn2_var": jnp.ones((out_channels,), jnp.float32),
    }
    if stride != 1 or in_channels != out_channels:
        sc_std = (2.0 / in_channels) ** 0.5
        params["w_shortcut"] = sc_std * jax.random.normal(
            jax.random.fold_in(key, 99), (out_channels, in_channels, 1, 1), jnp.float32)
    return params


if __name__ == "__main__":
    fwd = jax.jit(residual_block_forward, static_argnums=(2, 3, 4))

    configs = [
        # (N, Cin, Cout, H, W, stride)
        (2, 4, 8, 16, 16, 2),    # projection shortcut, stride 2 (parity-split input path)
        (2, 8, 8, 16, 16, 1),    # identity shortcut, small channels (eye-projection path)
        (2, 64, 64, 8, 8, 1),    # identity shortcut, cin_p == cout_p (direct VMEM add path)
        (1, 8, 16, 9, 9, 2),     # odd spatial dims, stride 2, projection shortcut
    ]
    key = jax.random.PRNGKey(0)
    for idx, (N, Cin, Cout, H, W, stride) in enumerate(configs):
        kx, kp = jax.random.split(jax.random.fold_in(key, idx))
        x = jax.random.normal(kx, (N, Cin, H, W), jnp.float32)
        params = make_params(kp, Cin, Cout, stride)

        out = jax.block_until_ready(fwd(x, params, stride, Cin, Cout))
        ref = residual_block_reference(x, params, stride, Cin, Cout)
        Ho, Wo = (H - 1) // stride + 1, (W - 1) // stride + 1
        assert out.shape == ref.shape == (N, Cout, Ho, Wo)
        # bf16 matmul operands across two stacked convs (f32 accumulation/epilogue);
        # the 64-channel config accumulates 576-term reductions, so keep a loose tolerance.
        err = float(jnp.max(jnp.abs(out - ref)))
        assert jnp.allclose(out, ref, atol=1e-1, rtol=1e-1), (
            f"config {idx}: max abs err {err}")
    print("KERNEL_OK")
</pallas_src>

<mosaic_0001>
module attributes {stable_mosaic.version = 11 : i64} {
  func.func @_resblock_kernel(%arg0: i32, %arg1: memref<1x584x8xbf16, #tpu.memory_space<vmem>>, %arg2: memref<72x128xbf16, #tpu.memory_space<vmem>>, %arg3: memref<1x128xf32, #tpu.memory_space<vmem>>, %arg4: memref<1152x128xbf16, #tpu.memory_space<vmem>>, %arg5: memref<1x128xf32, #tpu.memory_space<vmem>>, %arg6: memref<8x128xbf16, #tpu.memory_space<vmem>>, %arg7: memref<1x128x128xf32, #tpu.memory_space<vmem>>, %arg8: memref<176x128xf32, #tpu.memory_space<vmem>>) attributes {dimension_semantics = [#tpu.dimension_semantics<parallel>], iteration_bounds = array<i64: 2>, scalar_prefetch = 0 : i64, scratch_operands = 1 : i64, tpu.core_type = #tpu.core_type<tc>, window_params = [{transform_indices = @transform_0, window_bounds = array<i64: 1, 584, 8>}, {pipeline_mode = #tpu.pipeline_mode<synchronous>, transform_indices = @transform_1, window_bounds = array<i64: 72, 128>}, {pipeline_mode = #tpu.pipeline_mode<synchronous>, transform_indices = @transform_2, window_bounds = array<i64: 1, 128>}, {pipeline_mode = #tpu.pipeline_mode<synchronous>, transform_indices = @transform_3, window_bounds = array<i64: 1152, 128>}, {pipeline_mode = #tpu.pipeline_mode<synchronous>, transform_indices = @transform_4, window_bounds = array<i64: 1, 128>}, {pipeline_mode = #tpu.pipeline_mode<synchronous>, transform_indices = @transform_5, window_bounds = array<i64: 8, 128>}, {transform_indices = @transform_6, window_bounds = array<i64: 1, 128, 128>}]} {
    %cst = arith.constant 0.000000e+00 : f32
    %0 = vector.broadcast %cst : f32 to vector<24x128xf32>
    %c0 = arith.constant 0 : index
    %c0_0 = arith.constant 0 : index
    %1 = vector.load %arg8[%c0, %c0_0] : memref<176x128xf32, #tpu.memory_space<vmem>>, vector<24x128xf32>
    tpu.vector_store %arg8[%c0, %c0_0], %0 {strides = array<i32>} : memref<176x128xf32, #tpu.memory_space<vmem>>, vector<24x128xf32>,
    %c152 = arith.constant 152 : index
    %c0_1 = arith.constant 0 : index
    %2 = vector.load %arg8[%c152, %c0_1] : memref<176x128xf32, #tpu.memory_space<vmem>>, vector<24x128xf32>
    tpu.vector_store %arg8[%c152, %c0_1], %0 {strides = array<i32>} : memref<176x128xf32, #tpu.memory_space<vmem>>, vector<24x128xf32>,
    %c0_2 = arith.constant 0 : index
    %c0_3 = arith.constant 0 : index
    %c0_4 = arith.constant 0 : index
    %3 = vector.load %arg1[%c0_2, %c0_3, %c0_4] : memref<1x584x8xbf16, #tpu.memory_space<vmem>>, vector<1x128x8xbf16>
    %4 = vector.shape_cast %3 : vector<1x128x8xbf16> to vector<128x8xbf16>
    %c0_5 = arith.constant 0 : index
    %c144 = arith.constant 144 : index
    %c0_6 = arith.constant 0 : index
    %5 = vector.load %arg1[%c0_5, %c144, %c0_6] : memref<1x584x8xbf16, #tpu.memory_space<vmem>>, vector<1x128x8xbf16>
    %6 = vector.shape_cast %5 : vector<1x128x8xbf16> to vector<128x8xbf16>
    %c0_7 = arith.constant 0 : index
    %c1 = arith.constant 1 : index
    %c0_8 = arith.constant 0 : index
    %7 = vector.load %arg1[%c0_7, %c1, %c0_8] : memref<1x584x8xbf16, #tpu.memory_space<vmem>>, vector<1x128x8xbf16>
    %8 = vector.shape_cast %7 : vector<1x128x8xbf16> to vector<128x8xbf16>
    %c0_9 = arith.constant 0 : index
    %c288 = arith.constant 288 : index
    %c0_10 = arith.constant 0 : index
    %9 = vector.load %arg1[%c0_9, %c288, %c0_10] : memref<1x584x8xbf16, #tpu.memory_space<vmem>>, vector<1x128x8xbf16>
    %10 = vector.shape_cast %9 : vector<1x128x8xbf16> to vector<128x8xbf16>
    %c0_11 = arith.constant 0 : index
    %c432 = arith.constant 432 : index
    %c0_12 = arith.constant 0 : index
    %11 = vector.load %arg1[%c0_11, %c432, %c0_12] : memref<1x584x8xbf16, #tpu.memory_space<vmem>>, vector<1x128x8xbf16>
    %12 = vector.shape_cast %11 : vector<1x128x8xbf16> to vector<128x8xbf16>
    %c0_13 = arith.constant 0 : index
    %c289 = arith.constant 289 : index
    %c0_14 = arith.constant 0 : index
    %13 = vector.load %arg1[%c0_13, %c289, %c0_14] : memref<1x584x8xbf16, #tpu.memory_space<vmem>>, vector<1x128x8xbf16>
    %14 = vector.shape_cast %13 : vector<1x128x8xbf16> to vector<128x8xbf16>
    %c0_15 = arith.constant 0 : index
    %c16 = arith.constant 16 : index
    %c0_16 = arith.constant 0 : index
    %15 = vector.load %arg1[%c0_15, %c16, %c0_16] : memref<1x584x8xbf16, #tpu.memory_space<vmem>>, vector<1x128x8xbf16>
    %16 = vector.shape_cast %15 : vector<1x128x8xbf16> to vector<128x8xbf16>
    %c0_17 = arith.constant 0 : index
    %c160 = arith.constant 160 : index
    %c0_18 = arith.constant 0 : index
    %17 = vector.load %arg1[%c0_17, %c160, %c0_18] : memref<1x584x8xbf16, #tpu.memory_space<vmem>>, vector<1x128x8xbf16>
    %18 = vector.shape_cast %17 : vector<1x128x8xbf16> to vector<128x8xbf16>
    %c0_19 = arith.constant 0 : index
    %c17 = arith.constant 17 : index
    %c0_20 = arith.constant 0 : index
    %19 = vector.load %arg1[%c0_19, %c17, %c0_20] : memref<1x584x8xbf16, #tpu.memory_space<vmem>>, vector<1x128x8xbf16>
    %20 = vector.shape_cast %19 : vector<1x128x8xbf16> to vector<128x8xbf16>
    %21 = tpu.concatenate %4, %6, %8, %10, %12, %14, %16, %18, %20 in 1 : vector<128x8xbf16>, vector<128x8xbf16>, vector<128x8xbf16>, vector<128x8xbf16>, vector<128x8xbf16>, vector<128x8xbf16>, vector<128x8xbf16>, vector<128x8xbf16>, vector<128x8xbf16> -> vector<128x72xbf16>
    %c0_21 = arith.constant 0 : index
    %c0_22 = arith.constant 0 : index
    %22 = vector.load %arg2[%c0_21, %c0_22] : memref<72x128xbf16, #tpu.memory_space<vmem>>, vector<72x128xbf16>
    %cst_23 = arith.constant dense<0.000000e+00> : vector<128x128xf32>
    %23 = tpu.matmul %21, %22, %cst_23 {dimension_numbers = #tpu.dot_dimension_numbers<[1], [0], [0], [1], [0, 0, 1, 1], [], []>} : vector<128x72xbf16>, vector<72x128xbf16>, vector<128x128xf32> -> vector<128x128xf32>
    %c0_24 = arith.constant 0 : index
    %c0_25 = arith.constant 0 : index
    %24 = vector.load %arg3[%c0_24, %c0_25] : memref<1x128xf32, #tpu.memory_space<vmem>>, vector<1x128xf32>
    %25 = vector.broadcast %24 : vector<1x128xf32> to vector<128x128xf32>
    %26 = arith.addf %23, %25 : vector<128x128xf32>
    %cst_26 = arith.constant 0.000000e+00 : f32
    %27 = vector.broadcast %cst_26 : f32 to vector<128x128xf32>
    %28 = arith.maximumf %26, %27 : vector<128x128xf32>
    %29 = tpu.iota {dimensions = array<i32: 0>} : vector<128x1xi32>
    %c16_i32 = arith.constant 16 : i32
    %c0_i32 = arith.constant 0 : i32
    %30 = arith.cmpi eq, %c16_i32, %c0_i32 : i32
    %c1_i32 = arith.constant 1 : i32
    %31 = arith.select %30, %c1_i32, %c16_i32 : i32
    %32 = vector.broadcast %31 : i32 to vector<128x1xi32>
    %33 = arith.remsi %29, %32 : vector<128x1xi32>
    %c0_i32_27 = arith.constant 0 : i32
    %34 = vector.broadcast %c0_i32_27 : i32 to vector<128x1xi32>
    %35 = arith.cmpi ne, %33, %34 : vector<128x1xi32>
    %c0_i32_28 = arith.constant 0 : i32
    %36 = vector.broadcast %c0_i32_28 : i32 to vector<128x1xi32>
    %37 = arith.cmpi slt, %33, %36 : vector<128x1xi32>
    %c0_i32_29 = arith.constant 0 : i32
    %38 = arith.cmpi slt, %31, %c0_i32_29 : i32
    %39 = vector.broadcast %38 : i1 to vector<128x1xi1>
    %40 = vector.broadcast %39 : vector<128x1xi1> to vector<128x1xi1>
    %41 = arith.xori %37, %40 : vector<128x1xi1>
    %42 = arith.andi %41, %35 : vector<128x1xi1>
    %43 = vector.broadcast %31 : i32 to vector<128x1xi32>
    %44 = arith.addi %33, %43 : vector<128x1xi32>
    %45 = arith.select %42, %44, %33 : vector<128x1xi1>, vector<128x1xi32>
    %c8_i32 = arith.constant 8 : i32
    %46 = vector.broadcast %c8_i32 : i32 to vector<128x1xi32>
    %47 = arith.cmpi slt, %45, %46 : vector<128x1xi32>
    %cst_30 = arith.constant 0.000000e+00 : f32
    %48 = vector.shape_cast %47 : vector<128x1xi1> to vector<128x1xi1>
    %49 = vector.broadcast %48 : vector<128x1xi1> to vector<128x128xi1>
    %50 = vector.broadcast %cst_30 : f32 to vector<128x128xf32>
    %51 = arith.select %49, %28, %50 : vector<128x128xi1>, vector<128x128xf32>
    %c24 = arith.constant 24 : index
    %c0_31 = arith.constant 0 : index
    %52 = vector.load %arg8[%c24, %c0_31] : memref<176x128xf32, #tpu.memory_space<vmem>>, vector<128x128xf32>
    tpu.vector_store %arg8[%c24, %c0_31], %51 {strides = array<i32>} : memref<176x128xf32, #tpu.memory_space<vmem>>, vector<128x128xf32>,
    %c7 = arith.constant 7 : index
    %c0_32 = arith.constant 0 : index
    %53 = vector.load %arg8[%c7, %c0_32] : memref<176x128xf32, #tpu.memory_space<vmem>>, vector<128x128xf32>
    %54 = arith.truncf %53 : vector<128x128xf32> to vector<128x128xbf16>
    %c8 = arith.constant 8 : index
    %c0_33 = arith.constant 0 : index
    %55 = vector.load %arg8[%c8, %c0_33] : memref<176x128xf32, #tpu.memory_space<vmem>>, vector<128x128xf32>
    %56 = arith.truncf %55 : vector<128x128xf32> to vector<128x128xbf16>
    %c9 = arith.constant 9 : index
    %c0_34 = arith.constant 0 : index
    %57 = vector.load %arg8[%c9, %c0_34] : memref<176x128xf32, #tpu.memory_space<vmem>>, vector<128x128xf32>
    %58 = arith.truncf %57 : vector<128x128xf32> to vector<128x128xbf16>
    %c23 = arith.constant 23 : index
    %c0_35 = arith.constant 0 : index
    %59 = vector.load %arg8[%c23, %c0_35] : memref<176x128xf32, #tpu.memory_space<vmem>>, vector<128x128xf32>
    %60 = arith.truncf %59 : vector<128x128xf32> to vector<128x128xbf16>
    %c24_36 = arith.constant 24 : index
    %c0_37 = arith.constant 0 : index
    %61 = vector.load %arg8[%c24_36, %c0_37] : memref<176x128xf32, #tpu.memory_space<vmem>>, vector<128x128xf32>
    %62 = arith.truncf %61 : vector<128x128xf32> to vector<128x128xbf16>
    %c25 = arith.constant 25 : index
    %c0_38 = arith.constant 0 : index
    %63 = vector.load %arg8[%c25, %c0_38] : memref<176x128xf32, #tpu.memory_space<vmem>>, vector<128x128xf32>
    %64 = arith.truncf %63 : vector<128x128xf32> to vector<128x128xbf16>
    %c39 = arith.constant 39 : index
    %c0_39 = arith.constant 0 : index
    %65 = vector.load %arg8[%c39, %c0_39] : memref<176x128xf32, #tpu.memory_space<vmem>>, vector<128x128xf32>
    %66 = arith.truncf %65 : vector<128x128xf32> to vector<128x128xbf16>
    %c40 = arith.constant 40 : index
    %c0_40 = arith.constant 0 : index
    %67 = vector.load %arg8[%c40, %c0_40] : memref<176x128xf32, #tpu.memory_space<vmem>>, vector<128x128xf32>
    %68 = arith.truncf %67 : vector<128x128xf32> to vector<128x128xbf16>
    %c41 = arith.constant 41 : index
    %c0_41 = arith.constant 0 : index
    %69 = vector.load %arg8[%c41, %c0_41] : memref<176x128xf32, #tpu.memory_space<vmem>>, vector<128x128xf32>
    %70 = arith.truncf %69 : vector<128x128xf32> to vector<128x128xbf16>
    %71 = tpu.concatenate %54, %56, %58, %60, %62, %64, %66, %68, %70 in 1 : vector<128x128xbf16>, vector<128x128xbf16>, vector<128x128xbf16>, vector<128x128xbf16>, vector<128x128xbf16>, vector<128x128xbf16>, vector<128x128xbf16>, vector<128x128xbf16>, vector<128x128xbf16> -> vector<128x1152xbf16>
    %c0_42 = arith.constant 0 : index
    %c0_43 = arith.constant 0 : index
    %72 = vector.load %arg4[%c0_42, %c0_43] : memref<1152x128xbf16, #tpu.memory_space<vmem>>, vector<1152x128xbf16>
    %cst_44 = arith.constant dense<0.000000e+00> : vector<128x128xf32>
    %73 = tpu.matmul %71, %72, %cst_44 {dimension_numbers = #tpu.dot_dimension_numbers<[1], [0], [0], [1], [0, 0, 1, 1], [], []>} : vector<128x1152xbf16>, vector<1152x128xbf16>, vector<128x128xf32> -> vector<128x128xf32>
    %c0_45 = arith.constant 0 : index
    %c0_46 = arith.constant 0 : index
    %74 = vector.load %arg5[%c0_45, %c0_46] : memref<1x128xf32, #tpu.memory_space<vmem>>, vector<1x128xf32>
    %75 = vector.broadcast %74 : vector<1x128xf32> to vector<128x128xf32>
    %76 = arith.addf %73, %75 : vector<128x128xf32>
    %c0_47 = arith.constant 0 : index
    %c432_48 = arith.constant 432 : index
    %c0_49 = arith.constant 0 : index
    %77 = vector.load %arg1[%c0_47, %c432_48, %c0_49] : memref<1x584x8xbf16, #tpu.memory_space<vmem>>, vector<1x128x8xbf16>
    %78 = vector.shape_cast %77 : vector<1x128x8xbf16> to vector<128x8xbf16>
    %c0_50 = arith.constant 0 : index
    %c0_51 = arith.constant 0 : index
    %79 = vector.load %arg6[%c0_50, %c0_51] : memref<8x128xbf16, #tpu.memory_space<vmem>>, vector<8x128xbf16>
    %cst_52 = arith.constant dense<0.000000e+00> : vector<128x128xf32>
    %80 = tpu.matmul %78, %79, %cst_52 {dimension_numbers = #tpu.dot_dimension_numbers<[1], [0], [0], [1], [0, 0, 1, 1], [], []>} : vector<128x8xbf16>, vector<8x128xbf16>, vector<128x128xf32> -> vector<128x128xf32>
    %81 = arith.addf %76, %80 : vector<128x128xf32>
    %cst_53 = arith.constant 0.000000e+00 : f32
    %82 = vector.broadcast %cst_53 : f32 to vector<128x128xf32>
    %83 = arith.maximumf %81, %82 : vector<128x128xf32>
    %c0_54 = arith.constant 0 : index
    %c0_55 = arith.constant 0 : index
    %c0_56 = arith.constant 0 : index
    %84 = vector.load %arg7[%c0_54, %c0_55, %c0_56] : memref<1x128x128xf32, #tpu.memory_space<vmem>>, vector<1x128x128xf32>
    %85 = vector.shape_cast %84 : vector<1x128x128xf32> to vector<128x128xf32>
    %86 = vector.shape_cast %83 : vector<128x128xf32> to vector<1x128x128xf32>
    tpu.vector_store %arg7[%c0_54, %c0_55, %c0_56], %86 {strides = array<i32>} : memref<1x128x128xf32, #tpu.memory_space<vmem>>, vector<1x128x128xf32>,
    return
  }
  func.func @transform_0(%arg0: i32) -> (i32, i32, i32) {
    %c0_i32 = arith.constant 0 : i32
    %c0_i32_0 = arith.constant 0 : i32
    %c0_i32_1 = arith.constant 0 : i32
    return %arg0, %c0_i32, %c0_i32_0 : i32, i32, i32
  }
  func.func @transform_1(%arg0: i32) -> (i32, i32) {
    %c0_i32 = arith.constant 0 : i32
    %c0_i32_0 = arith.constant 0 : i32
    %c0_i32_1 = arith.constant 0 : i32
    return %c0_i32, %c0_i32_0 : i32, i32
  }
  func.func @transform_2(%arg0: i32) -> (i32, i32) {
    %c0_i32 = arith.constant 0 : i32
    %c0_i32_0 = arith.constant 0 : i32
    %c0_i32_1 = arith.constant 0 : i32
    return %c0_i32, %c0_i32_0 : i32, i32
  }
  func.func @transform_3(%arg0: i32) -> (i32, i32) {
    %c0_i32 = arith.constant 0 : i32
    %c0_i32_0 = arith.constant 0 : i32
    %c0_i32_1 = arith.constant 0 : i32
    return %c0_i32, %c0_i32_0 : i32, i32
  }
  func.func @transform_4(%arg0: i32) -> (i32, i32) {
    %c0_i32 = arith.constant 0 : i32
    %c0_i32_0 = arith.constant 0 : i32
    %c0_i32_1 = arith.constant 0 : i32
    return %c0_i32, %c0_i32_0 : i32, i32
  }
  func.func @transform_5(%arg0: i32) -> (i32, i32) {
    %c0_i32 = arith.constant 0 : i32
    %c0_i32_0 = arith.constant 0 : i32
    %c0_i32_1 = arith.constant 0 : i32
    return %c0_i32, %c0_i32_0 : i32, i32
  }
  func.func @transform_6(%arg0: i32) -> (i32, i32, i32) {
    %c0_i32 = arith.constant 0 : i32
    %c0_i32_0 = arith.constant 0 : i32
    %c0_i32_1 = arith.constant 0 : i32
    return %arg0, %c0_i32, %c0_i32_0 : i32, i32, i32
  }
}

</mosaic_0001>

<bundles_post_ra>
// kernel: residual_block_forward.1
= control target key start
LH: loop header
LB: loop body
LE: loop exit
PB: predicated region body
PF: predicated region fallthrough
CT: control target
= control target key end

     0   :  { %s3595_s21 = smov 0   ;;  %s4408_s0 = inlined_call_operand.vmem [shape: bf16[2,584,8], index: 0, kind: input, shape index: {}]   ;;  %s4409_s1 = inlined_call_operand.vmem [shape: bf16[72,128], index: 1, kind: input, shape index: {}]   ;;  %s4410_s2 = inlined_call_operand.vmem [shape: f32[1,128], index: 2, kind: input, shape index: {}]   ;;  %s4411_s3 = inlined_call_operand.vmem [shape: bf16[1152,128], index: 3, kind: input, shape index: {}]   ;;  %s4412_s4 = inlined_call_operand.vmem [shape: f32[1,128], index: 4, kind: input, shape index: {}]   ;;  %s4413_s5 = inlined_call_operand.vmem [shape: bf16[8,128], index: 5, kind: input, shape index: {}]   ;;  %s4414_s6 = inlined_call_operand.vmem [shape: f32[2,128,128], index: 6, kind: output, shape index: {}]  }
   0x1 LB: > { %s2831_s22 = sadd.s32 4294967295, %s3548_s21   ;;  %p2835_p0 = scmp.ge.s32.totalorder %s3548_s21, 1  ;;  %s3548_s21 = sphi %s3595_s21, %s16_s21  }
   0x2   : > { %p212_p1 = scmp.lt.s32.totalorder %s3548_s21, 3 }
   0x4   : > { %p213_p2 = pnand %p2835_p0, %p212_p1 }
   0x5   : > { %p242_p3 = scmp.lt.s32.totalorder (!%p213_p2), %s2831_s22, 1  ;;  %s3550_s27 = smov (!%p213_p2), 24   ;;  %vm429_vm0 = vsmask.f32 (!%p213_p2), 7424  ;;  %v3457_v52 = vld [vmem:[%s4409_s1] sm:$0xff] (!%p213_p2)   ;;  %v3458_v54 = vld [vmem:[%s4409_s1 + $0x8] sm:$0xff] (!%p213_p2)  }
   0x6   : > { %216 = sbr.rel (%p213_p2) target bundleno = 810 (0x32a), region = 44  ;;  %s3551_s28 = smov (!%p213_p2), 8   ;;  %3276 = vmatprep.subr.bf16.mxu0 (!%p213_p2), %v3457_v52  ;;  %v3459_v59 = vld [vmem:[%s4409_s1 + $0x10] sm:$0xff] (!%p213_p2)   ;;  %vm983_vm1 = vcmask (!%p213_p2), 1043456   ;;  %vm787_vm2 = vcmask (!%p213_p2), 64512   ;;  %vm804_vm3 = vcmask (!%p213_p2), 130048  }
   0x7   : > { %s3552_s29 = smov (!%p213_p2), 32   ;;  %s3553_s30 = smov (!%p213_p2), 16   ;;  %3277 = vmatpush3.bf16.msra.mxu0 (!%p213_p2), %v3457_v52  ;;  %vm821_vm4 = vcmask (!%p213_p2), 195584   ;;  %vm838_vm5 = vcmask (!%p213_p2), 261120   ;;  %vm855_vm6 = vcmask (!%p213_p2), 326656   ;;  %vm872_vm7 = vcmask (!%p213_p2), 392192  }
   0x8   : > { %s3554_s7 = smov (!%p213_p2), 40   ;;  %s3555_s8 = smov (!%p213_p2), 48   ;;  %3278 = vmatprep.subr.bf16.mxu0 (!%p213_p2), %v3458_v54  ;;  %vm889_vm8 = vcmask (!%p213_p2), 457728   ;;  %vm906_vm9 = vcmask (!%p213_p2), 523264   ;;  %vm966_vm10 = vcmask (!%p213_p2), 588800  }
   0x9   : > { %s3556_s9 = smov (!%p213_p2), 56   ;;  %s3557_s10 = smov (!%p213_p2), 64  }
   0xb   : > { %3279 = vmatpush3.bf16.msra.mxu0 (!%p213_p2), %v3458_v54 }
   0xc   : > { %3280 = vmatprep.subr.bf16.mxu0 (!%p213_p2), %v3459_v59 }
   0xd   : > { %s4416_s22 = smov (!%p242_p3, %s2831_s22), 1 }
   0xe   : > { %s3402_s23 = smul.u32 292, %s4416_s22 }
   0xf   : > { %3281 = vmatpush3.bf16.msra.mxu0 %v3459_v59 }
  0x10   : > { %s3609_s26 = scalar_lea.vmem %s4408_s0, %s3402_s23 }
  0x11   : > { %v3420_v0 = vld [vmem:[%s3609_s26 + $0x98] sm:$0xff]   ;;  %v3421_v1 = vld [vmem:[%s3609_s26 + $0x48] sm:$0xff]   ;;  %v3422_v2 = vld [vmem:[%s3609_s26 + $0xe0] sm:$0xff]  }
  0x12   : > { %556 = vrot.lane.b32.xlu1 %v3420_v0, %s3550_s27  ;;  %410 = vrot.lane.b32.xlu0 %v3421_v1, %s3551_s28  ;;  %v3423_v3 = vld [vmem:[%s3609_s26 + $0x50] sm:$0xff]   ;;  %v3620_v6 = vld [vmem:[%s3609_s26] sm:$0xff]   ;;  %v637_v8 = vshll.u32 %v3420_v0, 16  ;;  %v641_v10 = vshrl.u32 %v3420_v0, 16 }
  0x13   : > { %v3424_v4 = vld [vmem:[%s3609_s26 + $0x90] sm:$0xff]   ;;  %v3623_v7 = vld [vmem:[%s3609_s26 + $0x8] sm:$0xff]   ;;  %v431_v11 = vshrl.u32 %v3620_v6, 16  ;;  %v433_v12 = vshll.u32 %v3620_v6, 16  ;;  %v3429_v20 = vld [vmem:[%s3609_s26 + $0xa0] sm:$0xff]  }
  0x14   : > { %v632_v5 = vshll.u32 %v3424_v4, 16  ;;  %v630_v9 = vshrl.u32 %v3424_v4, 16  ;;  %v438_v13 = vshll.u32 %v3623_v7, 16  ;;  %v3630_v14 = vld [vmem:[%s3609_s26 + $0x10] sm:$0xff]   ;;  %v442_v15 = vshrl.u32 %v3623_v7, 16  ;;  %v3427_v21 = vld [vmem:[%s3609_s26 + $0xd8] sm:$0xff]  }
  0x15   : > { %v435_v17 = vrot.slane %v433_v12, 1  ;;  %v446_v19 = vshll.u32 %v3630_v14, 16  ;;  %v639_v23 = vrot.slane %v637_v8, 1  ;;  %v645_v27 = vshll.u32 %v3429_v20, 16  ;;  %v3646_v34 = vld [vmem:[%s3609_s26 + $0x18] sm:$0xff]   ;;  %v3658_v40 = vld [vmem:[%s3609_s26 + $0x20] sm:$0xff]  }
  0x16   : > { %612 = vrot.lane.b32.xlu1 %v3422_v2, %s3552_s29  ;;  %412 = vrot.lane.b32.xlu0 %v3423_v3, %s3551_s28  ;;  %v634_v16 = vrot.slane %v632_v5, 1  ;;  %v440_v18 = vrot.slane %v438_v13, 1  ;;  %v450_v35 = vshrl.u32 %v3630_v14, 16  ;;  %v454_v36 = vshll.u32 %v3646_v34, 16  ;;  %v3430_v37 = vld [vmem:[%s3609_s26 + $0x58] sm:$0xff]   ;;  %v3432_v44 = vld [vmem:[%s3609_s26 + $0x60] sm:$0xff]  }
  0x17   : > { %v436_v24 = vor.u32 %v435_v17, %v431_v11  ;;  %v448_v26 = vrot.slane %v446_v19, 1  ;;  %v643_v31 = vor.u32 %v641_v10, %v639_v23  ;;  %v647_v32 = vrot.slane %v645_v27, 1  ;;  %v3434_v47 = vld [vmem:[%s3609_s26 + $0xa8] sm:$0xff]   ;;  %v3672_v48 = vld [vmem:[%s3609_s26 + $0xb0] sm:$0xff]   ;;  %v3460_v0 = vld [vmem:[%s4409_s1 + $0x18] sm:$0xff]  }
  0x18   : > { %v635_v22 = vor.u32 %v634_v16, %v630_v9  ;;  %v444_v25 = vor.u32 %v442_v15, %v440_v18  ;;  %v456_v39 = vrot.slane %v454_v36, 1  ;;  %v458_v42 = vshrl.u32 %v3646_v34, 16  ;;  %v3435_v53 = vld [vmem:[%s3609_s26 + $0xe8] sm:$0xff]   ;;  %v3436_v60 = vld [vmem:[%s3609_s26 + $0xf0] sm:$0xff]   ;;  %v3461_v2 = vld [vmem:[%s4409_s1 + $0x20] ss:$0 sps:$4 sm:$0xff]   ;;  %3282 = vmatprep.subr.bf16.mxu0 %v3460_v0 }
  0x19   : > { %v441_v28 = vsel %vm429_vm0, %v436_v24, %v440_v18  ;;  %v648_v33 = vsel %vm429_vm0, %v643_v31, %v647_v32  ;;  %v452_v38 = vor.u32 %v450_v35, %v448_v26  ;;  %v462_v43 = vshll.u32 %v3658_v40, 16  ;;  %v3696_v1 = vld [vmem:[%s3609_s26 + $0x28] sm:$0xff]   ;;  %v3712_v10 = vld [vmem:[%s3609_s26 + $0x30] sm:$0xff]   ;;  %3283 = vmatpush3.bf16.msra.mxu0 %v3460_v0  ;;  %v3442_v18 = vld [vmem:[%s3609_s26 + $0xb8] sm:$0xff]  }
  0x1a   : > { %554 = vrot.lane.b32.xlu0 %v3424_v4, %s3550_s27  ;;  %498 = vrot.lane.b32.xlu1 %v441_v28, %s3553_s30  ;;  %v449_v29 = vsel %vm429_vm0, %v444_v25, %v448_v26  ;;  %v640_v30 = vsel %vm429_vm0, %v635_v22, %v639_v23  ;;  %v460_v45 = vor.u32 %v458_v42, %v456_v39  ;;  %v649_v50 = vshrl.u32 %v3429_v20, 16  ;;  %v3438_v9 = vld [vmem:[%s3609_s26 + $0x68] sm:$0xff]   ;;  %v3440_v17 = vld [vmem:[%s3609_s26 + $0x70] sm:$0xff]  }
  0x1b   : > { %v457_v41 = vsel %vm429_vm0, %v452_v38, %v456_v39  ;;  %v464_v46 = vrot.slane %v462_v43, 1  ;;  %v653_v51 = vshll.u32 %v3434_v47, 16  ;;  %v657_v55 = vshrl.u32 %v3434_v47, 16  ;;  %3400 = vmatprep.subr.msk.bf16.mxu0 %vm983_vm1, %v3461_v2  ;;  %v3445_v22 = vld [vmem:[%s3609_s26 + $0xc0] sm:$0xff]   ;;  %v3443_v26 = vld [vmem:[%s3609_s26 + $0xf8] sm:$0xff]  }
  0x1c   : > { %v661_v56 = vshll.u32 %v3672_v48, 16  ;;  %v651_v57 = vor.u32 %v649_v50, %v647_v32  ;;  %v470_v5 = vshll.u32 %v3696_v1, 16  ;;  %v985_v8 = vsel %vm983_vm1, %v3461_v2, 0  ;;  %v3741_v35 = vld [vmem:[%s3609_s26 + $0x38] sm:$0xff]   ;;  %v3450_v50 = vld [vmem:[%s3609_s26 + $0xc8] sm:$0xff]   ;;  %v3454_v0 = vld [vmem:[%s3609_s26 + $0x40] sm:$0xff]  }
  0x1d   : > { %v465_v49 = vsel %vm429_vm0, %v460_v45, %v464_v46  ;;  %v655_v58 = vrot.slane %v653_v51, 1  ;;  %3285 = vmatpush3.bf16.msra.mxu0 %v985_v8  ;;  %v474_v13 = vshrl.u32 %v3696_v1, 16  ;;  %v478_v15 = vshll.u32 %v3712_v10, 16  ;;  %v3446_v39 = vld [vmem:[%s3609_s26 + $0x78] sm:$0xff]  }
  0x1e   : > { %610 = vrot.lane.b32.xlu0 %v3427_v21, %s3552_s29  ;;  %500 = vrot.lane.b32.xlu1 %v449_v29, %s3553_s30  ;;  %v663_v61 = vrot.slane %v661_v56, 1  ;;  %v472_v11 = vrot.slane %v470_v5, 1  ;;  %v669_v23 = vshll.u32 %v3442_v18, 16  ;;  %v673_v24 = vshrl.u32 %v3442_v18, 16 }
  0x1f   : > { %v656_v62 = vsel %vm429_vm0, %v651_v57, %v655_v58  ;;  %v659_v63 = vor.u32 %v657_v55, %v655_v58  ;;  %v480_v19 = vrot.slane %v478_v15, 1  ;;  %v677_v28 = vshll.u32 %v3445_v22, 16  ;;  %v3453_v54 = vld [vmem:[%s3609_s26 + $0xd0] ss:$0 sps:$4 sm:$0x11]   ;;  %v3451_v55 = vld [vmem:[%s3609_s26 + $0x108] sm:$0xff]  }
  0x20   : > { %v476_v21 = vor.u32 %v474_v13, %v472_v11  ;;  %v671_v27 = vrot.slane %v669_v23, 1  ;;  %v486_v38 = vshll.u32 %v3741_v35, 16  ;;  %v681_v52 = vshrl.u32 %v3445_v22, 16 }
  0x21   : > { %v664_v4 = vsel %vm429_vm0, %v659_v63, %v663_v61  ;;  %v679_v31 = vrot.slane %v677_v28, 1  ;;  %v689_v58 = vshrl.u32 %v3450_v50, 16  ;;  %v693_v59 = vshll.u32 %v3453_v54, 16  ;;  %v3470_v28 = vld [vmem:[%s4411_s3 + $0x58] sm:$0xff]  }
  0x22   : > { %697 = vrot.lane.b32.xlu0 %v640_v30, %s3554_s7  ;;  %699 = vrot.lane.b32.xlu1 %v648_v33, %s3554_s7  ;;  %v481_v25 = vsel %vm429_vm0, %v476_v21, %v480_v19  ;;  %v3444_v30 = vld [vmem:[%s3609_s26 + $0x100] sm:$0xff]   ;;  %v675_v33 = vor.u32 %v673_v24, %v671_v27  ;;  %v488_v42 = vrot.slane %v486_v38, 1  ;;  %v763_v13 = vshrl.u32 %v3454_v0, 16  ;;  %v3455_v21 = vld [vmem:[%s3609_s26 + $0x88] sm:$0xff]  }
  0x23   : > { %v683_v56 = vor.u32 %v681_v52, %v679_v31  ;;  %v695_v63 = vrot.slane %v693_v59, 1  ;;  %v3476_v38 = vld [vmem:[%s4411_s3 + $0x20] sm:$0xff]  }
  0x24   : > { %v680_v36 = vsel %vm429_vm0, %v675_v33, %v679_v31  ;;  %v3474_v33 = vld [vmem:[%s4411_s3 + $0x60] sm:$0xff]  }
  0x26   : > { %718 = vrot.lane.b32.xlu0 %v3623_v7, %s3555_s8  ;;  %720 = vrot.lane.b32.xlu1 %v3630_v14, %s3555_s8 }
  0x2a   : > { %739 = vrot.lane.b32.xlu0 %v3423_v3, %s3556_s9  ;;  %741 = vrot.lane.b32.xlu1 %v3430_v37, %s3556_s9  ;;  %v466_v3 = vshrl.u32 %v3658_v40, 16 }
  0x2c   : > { %v468_v12 = vor.u32 %v466_v3, %v464_v46  ;;  %v759_v3 = vshll.u32 %v3454_v0, 16 }
  0x2e   : > { %771 = vrot.lane.b32.xlu0 %v449_v29, %s3557_s10  ;;  %773 = vrot.lane.b32.xlu1 %v457_v41, %s3557_s10  ;;  %v473_v16 = vsel %vm429_vm0, %v468_v12, %v472_v11  ;;  %v3463_v11 = vld [vmem:[%s4411_s3] sm:$0xff]   ;;  %v761_v12 = vrot.slane %v759_v3, 1  ;;  %v3473_v3 = vld [vmem:[%s4411_s3 + $0x88] sm:$0xff]  }
  0x30   : > { %v765_v23 = vor.u32 %v763_v13, %v761_v12  ;;  %v3479_v13 = vld [vmem:[%s4411_s3 + $0xd8] sm:$0xff]  }
  0x32   : > { %414 = vrot.lane.b32.xlu0 %v3430_v37, %s3551_s28  ;;  %416 = vrot.lane.b32.xlu1 %v3432_v44, %s3551_s28  ;;  %v482_v37 = vshrl.u32 %v3712_v10, 16 }
  0x34   : > { %v484_v43 = vor.u32 %v482_v37, %v480_v19  ;;  %v3465_v19 = vld [vmem:[%s4411_s3 + $0x8] sm:$0xff]  }
  0x36   : > { %502 = vrot.lane.b32.xlu0 %v457_v41, %s3553_s30  ;;  %504 = vrot.lane.b32.xlu1 %v465_v49, %s3553_s30  ;;  %v3449_v41 = vld [vmem:[%s3609_s26 + $0x40] ss:$0 sps:$4 sm:$0x11]   ;;  %v489_v46 = vsel %vm429_vm0, %v484_v43, %v488_v42 }
  0x37   : > { %v494_v45 = vshll.u32 %v3449_v41, 16 }
  0x3a   : > { %558 = vrot.lane.b32.xlu0 %v3429_v20, %s3550_s27  ;;  %560 = vrot.lane.b32.xlu1 %v3434_v47, %s3550_s27  ;;  %v665_v20 = vshrl.u32 %v3672_v48, 16  ;;  %v3448_v47 = vld [vmem:[%s3609_s26 + $0x80] sm:$0xff]  }
  0x3c   : > { %v667_v29 = vor.u32 %v665_v20, %v663_v61 }
  0x3e   : > { %614 = vrot.lane.b32.xlu0 %v3435_v53, %s3552_s29  ;;  %616 = vrot.lane.b32.xlu1 %v3436_v60, %s3552_s29  ;;  %v672_v32 = vsel %vm429_vm0, %v667_v29, %v671_v27  ;;  %v685_v53 = vshll.u32 %v3450_v50, 16  ;;  %v3452_v60 = vld [vmem:[%s3609_s26 + $0x110] sm:$0xff]  }
  0x3f   : > { %v3468_v27 = vld [vmem:[%s4411_s3 + $0x10] sm:$0xff]  }
  0x40   : > { %v687_v57 = vrot.slane %v685_v53, 1 }
  0x42   : > { %701 = vrot.lane.b32.xlu0 %v656_v62, %s3554_s7  ;;  %703 = vrot.lane.b32.xlu1 %v664_v4, %s3554_s7  ;;  %v688_v61 = vsel %vm429_vm0, %v683_v56, %v687_v57  ;;  %v691_v62 = vor.u32 %v689_v58, %v687_v57  ;;  %v3456_v4 = vld [vmem:[%s3609_s26 + $0x48] ss:$0 sps:$4 sm:$0x11]  }
  0x43   : > { %v767_v15 = vshll.u32 %v3456_v4, 16 }
  0x44   : > { %v696_v2 = vsel %vm429_vm0, %v691_v62, %v695_v63 }
  0x45   : > { %v769_v24 = vrot.slane %v767_v15, 1  ;;  %v3481_v15 = vld [vmem:[%s4411_s3 + $0x98] sm:$0xff]  }
  0x46   : > { %722 = vrot.lane.b32.xlu0 %v3646_v34, %s3555_s8  ;;  %724 = vrot.lane.b32.xlu1 %v3658_v40, %s3555_s8 }
  0x47   : > { %v770_v29 = vsel %vm429_vm0, %v765_v23, %v769_v24 }
  0x4a   : > { %743 = vrot.lane.b32.xlu0 %v3432_v44, %s3556_s9  ;;  %745 = vrot.lane.b32.xlu1 %v3438_v9, %s3556_s9  ;;  %v490_v44 = vshrl.u32 %v3741_v35, 16 }
  0x4e   : > { %775 = vrot.lane.b32.xlu0 %v465_v49, %s3557_s10  ;;  %777 = vrot.lane.b32.xlu1 %v473_v16, %s3557_s10  ;;  %v496_v49 = vrot.slane %v494_v45, 1 }
  0x52   : > { %418 = vrot.lane.b32.xlu0 %v3438_v9, %s3551_s28  ;;  %420 = vrot.lane.b32.xlu1 %v3440_v17, %s3551_s28  ;;  %v3462_v9 = vld [vmem:[%s4411_s3 + $0x40] sm:$0xff]  }
  0x53   : > { %2995 = vmatprep.subr.bf16.mxu1 %v3462_v9  ;;  %v3477_v9 = vld [vmem:[%s4411_s3 + $0x90] sm:$0xff]  }
  0x54   : > { %2996 = vmatpush3.bf16.msra.mxu1 %v3463_v11 }
  0x56   : > { %506 = vrot.lane.b32.xlu0 %v473_v16, %s3553_s30  ;;  %508 = vrot.lane.b32.xlu1 %v481_v25, %s3553_s30  ;;  %v3464_v16 = vld [vmem:[%s4411_s3 + $0x48] sm:$0xff]  }
  0x57   : > { %2997 = vmatprep.subr.bf16.mxu1 %v3464_v16 }
  0x58   : > { %2998 = vmatpush3.bf16.msra.mxu1 %v3465_v19 }
  0x5a   : > { %562 = vrot.lane.b32.xlu0 %v3672_v48, %s3550_s27  ;;  %564 = vrot.lane.b32.xlu1 %v3442_v18, %s3550_s27  ;;  %v492_v48 = vor.u32 %v490_v44, %v488_v42  ;;  %v3467_v18 = vld [vmem:[%s4411_s3 + $0xc0] sm:$0xff]  }
  0x5b   : > { %3059 = vmatprep.subr.bf16.mxu0 %v3467_v18 }
  0x5c   : > { %v497_v51 = vsel %vm429_vm0, %v492_v48, %v496_v49 }
  0x5e   : > { %618 = vrot.lane.b32.xlu0 %v3443_v26, %s3552_s29  ;;  %620 = vrot.lane.b32.xlu1 %v3444_v30, %s3552_s29 }
  0x62   : > { %705 = vrot.lane.b32.xlu0 %v672_v32, %s3554_s7  ;;  %707 = vrot.lane.b32.xlu1 %v680_v36, %s3554_s7  ;;  %v3472_v32 = vld [vmem:[%s4411_s3 + $0x18] sm:$0xff]  }
  0x66   : > { %726 = vrot.lane.b32.xlu0 %v3696_v1, %s3555_s8  ;;  %728 = vrot.lane.b32.xlu1 %v3712_v10, %s3555_s8 }
  0x6a   : > { %747 = vrot.lane.b32.xlu0 %v3440_v17, %s3556_s9  ;;  %749 = vrot.lane.b32.xlu1 %v3446_v39, %s3556_s9 }
  0x6e   : > { %779 = vrot.lane.b32.xlu0 %v481_v25, %s3557_s10  ;;  %781 = vrot.lane.b32.xlu1 %v489_v46, %s3557_s10  ;;  %v3466_v25 = vld [vmem:[%s4411_s3 + $0x50] sm:$0xff]  }
  0x6f   : > { %2999 = vmatprep.subr.bf16.mxu1 %v3466_v25 }
  0x70   : > { %3000 = vmatpush3.bf16.msra.mxu1 %v3468_v27 }
  0x71   : > { %3001 = vmatprep.subr.bf16.mxu1 %v3470_v28 }
  0x72   : > { %422 = vrot.lane.b32.xlu0 %v3446_v39, %s3551_s28  ;;  %424 = vrot.lane.b32.xlu1 %v3448_v47, %s3551_s28  ;;  %v3478_v39 = vld [vmem:[%s4411_s3 + $0x68] sm:$0xff]  }
  0x74   : > { %3002 = vmatpush3.bf16.msra.mxu1 %v3472_v32 }
  0x75   : > { %3003 = vmatprep.subr.bf16.mxu1 %v3474_v33 }
  0x76   : > { %510 = vrot.lane.b32.xlu0 %v489_v46, %s3553_s30  ;;  %512 = vrot.lane.b32.xlu1 %v497_v51, %s3553_s30 }
  0x78   : > { %3004 = vmatpush3.bf16.msra.mxu1 %v3476_v38 }
  0x79   : > { %3005 = vmatprep.subr.bf16.mxu1 %v3478_v39 }
  0x7a   : > { %566 = vrot.lane.b32.xlu0 %v3445_v22, %s3550_s27  ;;  %568 = vrot.lane.b32.xlu1 %v3450_v50, %s3550_s27  ;;  %v762_v22 = vsel %vm429_vm0, %v492_v48, %v761_v12 }
  0x7e   : > { %622 = vrot.lane.b32.xlu0 %v3451_v55, %s3552_s29  ;;  %624 = vrot.lane.b32.xlu1 %v3452_v60, %s3552_s29  ;;  %v3469_v60 = vld [vmem:[%s4411_s3 + $0x80] sm:$0xff]  }
  0x82   : > { %709 = vrot.lane.b32.xlu0 %v688_v61, %s3554_s7  ;;  %711 = vrot.lane.b32.xlu1 %v696_v2, %s3554_s7 }
  0x84   : > { %v557_v5 = vpop.permute.xlu1 %556  ;;  %v411_v8 = vpop.permute.xlu0 %410 }
  0x85   : > { %v789_v41 = vsel %vm787_vm2, %v3620_v6, %v411_v8  ;;  %v3475_v8 = vld [vmem:[%s4411_s3 + $0xd0] sm:$0xff]  }
  0x86   : > { %730 = vrot.lane.b32.xlu0 %v3741_v35, %s3555_s8  ;;  %732 = vrot.lane.b32.xlu1 %v3454_v0, %s3555_s8  ;;  %v3471_v0 = vld [vmem:[%s4411_s3 + $0xc8] sm:$0xff]  }
  0x88   : > { %v413_v17 = vpop.permute.xlu0 %412  ;;  %v613_v20 = vpop.permute.xlu1 %612 }
  0x89   : > { %v791_v42 = vsel %vm787_vm2, %v3623_v7, %v413_v17 }
  0x8a   : > { %751 = vrot.lane.b32.xlu0 %v3448_v47, %s3556_s9  ;;  %753 = vrot.lane.b32.xlu1 %v3455_v21, %s3556_s9  ;;  %v3480_v47 = vld [vmem:[%s4411_s3 + $0x28] sm:$0xff]  }
  0x8b   : > { %3006 = vmatpush3.bf16.msra.mxu1 %v3480_v47 }
  0x8c   : > { %v555_v26 = vpop.permute.xlu0 %554  ;;  %v499_v30 = vpop.permute.xlu1 %498 }
  0x8d   : > { %v806_v45 = vsel %vm804_vm3, %v789_v41, %v499_v30 }
  0x8e   : > { %783 = vrot.lane.b32.xlu0 %v762_v22, %s3557_s10  ;;  %785 = vrot.lane.b32.xlu1 %v770_v29, %s3557_s10  ;;  %v823_v6 = vsel %vm821_vm4, %v806_v45, %v555_v26 }
  0x90   : > { %v611_v31 = vpop.permute.xlu0 %610  ;;  %v501_v36 = vpop.permute.xlu1 %500 }
  0x91   : > { %v808_v46 = vsel %vm804_vm3, %v791_v42, %v501_v36  ;;  %v840_v50 = vsel %vm838_vm5, %v823_v6, %v611_v31 }
  0x92   : > { %v825_v48 = vsel %vm821_vm4, %v808_v46, %v557_v5 }
  0x93   : > { %v842_v52 = vsel %vm838_vm5, %v825_v48, %v613_v20 }
  0x94   : > { %v698_v37 = vpop.permute.xlu0 %697  ;;  %v700_v43 = vpop.permute.xlu1 %699 }
  0x95   : > { %v857_v51 = vsel %vm855_vm6, %v840_v50, %v698_v37  ;;  %v859_v58 = vsel %vm855_vm6, %v842_v52, %v700_v43 }
  0x98   : > { %v719_v44 = vpop.permute.xlu0 %718  ;;  %v721_v7 = vpop.permute.xlu1 %720 }
  0x99   : > { %v874_v53 = vsel %vm872_vm7, %v857_v51, %v719_v44  ;;  %v876_v59 = vsel %vm872_vm7, %v859_v58, %v721_v7 }
  0x9c   : > { %v740_v49 = vpop.permute.xlu0 %739  ;;  %v742_v55 = vpop.permute.xlu1 %741 }
  0x9d   : > { %v891_v54 = vsel %vm889_vm8, %v874_v53, %v740_v49  ;;  %v893_v61 = vsel %vm889_vm8, %v876_v59, %v742_v55 }
  0xa0   : > { %v772_v56 = vpop.permute.xlu0 %771  ;;  %v774_v62 = vpop.permute.xlu1 %773 }
  0xa1   : > { %v908_v57 = vsel %vm906_vm9, %v891_v54, %v772_v56  ;;  %v910_v2 = vsel %vm906_vm9, %v893_v61, %v774_v62 }
  0xa2   : > { %3286 = vmatprep.mubr.msk.bf16.mxu0 %vm966_vm10, %v908_v57 }
  0xa3   : > { %3287 = vmatmul.mubr.msk.bf16.vlgmr.msra.gmra.mrb[0].mxu0 %vm966_vm10, %v910_v2 }
  0xa4   : > { %v415_v63 = vpop.permute.xlu0 %414  ;;  %3060 = vmatpush3.bf16.msra.mxu0 %v3469_v60  ;;  %v417_v4 = vpop.permute.xlu1 %416 }
  0xa5   : > { %3061 = vmatprep.subr.bf16.mxu0 %v3471_v0  ;;  %v793_v22 = vsel %vm787_vm2, %v3630_v14, %v415_v63  ;;  %v795_v28 = vsel %vm787_vm2, %v3646_v34, %v417_v4 }
  0xa8   : > { %v503_v5 = vpop.permute.xlu0 %502  ;;  %3062 = vmatpush3.bf16.msra.mxu0 %v3473_v3  ;;  %v505_v11 = vpop.permute.xlu1 %504 }
  0xa9   : > { %3063 = vmatprep.subr.bf16.mxu0 %v3475_v8  ;;  %v810_v23 = vsel %vm804_vm3, %v793_v22, %v503_v5  ;;  %v812_v30 = vsel %vm804_vm3, %v795_v28, %v505_v11  ;;  %v3482_v22 = vld [vmem:[%s4411_s3 + $0x70] sm:$0xff]  }
  0xaa   : > { %3007 = vmatprep.subr.bf16.mxu1 %v3482_v22 }
  0xac   : > { %v559_v12 = vpop.permute.xlu0 %558  ;;  %3064 = vmatpush3.bf16.msra.mxu0 %v3477_v9  ;;  %v561_v16 = vpop.permute.xlu1 %560 }
  0xad   : > { %3065 = vmatprep.subr.bf16.mxu0 %v3479_v13  ;;  %v827_v24 = vsel %vm821_vm4, %v810_v23, %v559_v12  ;;  %v829_v32 = vsel %vm821_vm4, %v812_v30, %v561_v16  ;;  %v3558_v23 = vmov 0.0  }
  0xae   : > { %254 = vst [vmem:[#allocation2 + $0x8] sm:$0xff] %v3558_v23  ;;  %255 = vst [vmem:[#allocation2 + $0x10] sm:$0xff] %v3558_v23 }
  0xaf   : > { %253 = vst [vmem:[#allocation2] sm:$0xff] %v3558_v23  ;;  %256 = vst [vmem:[#allocation2 + $0x98] sm:$0xff] %v3558_v23 }
  0xb0   : > { %v615_v17 = vpop.permute.xlu0 %614  ;;  %3066 = vmatpush3.bf16.msra.mxu0 %v3481_v15  ;;  %v617_v18 = vpop.permute.xlu1 %616  ;;  %257 = vst [vmem:[#allocation2 + $0xa0] sm:$0xff] %v3558_v23  ;;  %258 = vst [vmem:[#allocation2 + $0xa8] sm:$0xff] %v3558_v23 }
  0xb1   : > { %v844_v27 = vsel %vm838_vm5, %v827_v24, %v615_v17  ;;  %v846_v37 = vsel %vm838_vm5, %v829_v32, %v617_v18  ;;  %1374 = vst [vmem:[#allocation2 + $0x20] sm:$0xff] %v3558_v23  ;;  %1376 = vst [vmem:[#allocation2 + $0x30] sm:$0xff] %v3558_v23 }
  0xb2   : > { %1378 = vst [vmem:[#allocation2 + $0x40] sm:$0xff] %v3558_v23  ;;  %1380 = vst [vmem:[#allocation2 + $0x50] sm:$0xff] %v3558_v23 }
  0xb3   : > { %1382 = vst [vmem:[#allocation2 + $0x60] sm:$0xff] %v3558_v23  ;;  %1384 = vst [vmem:[#allocation2 + $0x70] sm:$0xff] %v3558_v23 }
  0xb4   : > { %v702_v19 = vpop.permute.xlu0 %701  ;;  %v704_v20 = vpop.permute.xlu1 %703  ;;  %1386 = vst [vmem:[#allocation2 + $0x80] sm:$0xff] %v3558_v23  ;;  %1388 = vst [vmem:[#allocation2 + $0x90] sm:$0xff] %v3558_v23 }
  0xb5   : > { %v861_v29 = vsel %vm855_vm6, %v844_v27, %v702_v19  ;;  %v863_v39 = vsel %vm855_vm6, %v846_v37, %v704_v20  ;;  %v3483_v27 = vld [vmem:[%s4411_s3 + $0xe0] sm:$0xff]   ;;  %v3487_v37 = vld [vmem:[%s4411_s3 + $0xe8] sm:$0xff]  }
  0xb6   : > { %3067 = vmatprep.subr.bf16.mxu0 %v3483_v27  ;;  %v1437_v27 = vld [vmem:[#allocation2 + $0x9] sm:$0xff] }
  0xb8   : > { %v723_v21 = vpop.permute.xlu0 %722  ;;  %v725_v25 = vpop.permute.xlu1 %724 }
  0xb9   : > { %v878_v31 = vsel %vm872_vm7, %v861_v29, %v723_v21  ;;  %v880_v34 = vsel %vm872_vm7, %v863_v39, %v725_v25  ;;  %v3485_v29 = vld [vmem:[%s4411_s3 + $0xa0] sm:$0xff]  }
  0xba   : > { %3068 = vmatpush3.bf16.msra.mxu0 %v3485_v29 }
  0xbb   : > { %3069 = vmatprep.subr.bf16.mxu0 %v3487_v37  ;;  %v3502_v37 = vld [vmem:[%s4411_s3 + $0x1c8] sm:$0xff]  }
  0xbc   : > { %v744_v26 = vpop.permute.xlu0 %743  ;;  %v746_v33 = vpop.permute.xlu1 %745 }
  0xbd   : > { %v895_v14 = vsel %vm889_vm8, %v878_v31, %v744_v26  ;;  %v897_v41 = vsel %vm889_vm8, %v880_v34, %v746_v33  ;;  %v3484_v26 = vld [vmem:[%s4411_s3 + $0x30] sm:$0xff]   ;;  %v3486_v31 = vld [vmem:[%s4411_s3 + $0x78] sm:$0xff]   ;;  %v3489_v34 = vld [vmem:[%s4411_s3 + $0xa8] sm:$0xff]  }
  0xbe   : > { %3008 = vmatpush3.bf16.msra.mxu1 %v3484_v26  ;;  %3070 = vmatpush3.bf16.msra.mxu0 %v3489_v34  ;;  %v3506_v34 = vld [vmem:[%s4411_s3 + $0x1d0] sm:$0xff]  }
  0xbf   : > { %3009 = vmatprep.subr.bf16.mxu1 %v3486_v31 }
  0xc0   : > { %v776_v36 = vpop.permute.xlu0 %775  ;;  %v778_v42 = vpop.permute.xlu1 %777 }
  0xc1   : > { %v912_v38 = vsel %vm906_vm9, %v895_v14, %v776_v36  ;;  %v914_v44 = vsel %vm906_vm9, %v897_v41, %v778_v42  ;;  %v1389_v41 = vld [vmem:[#allocation2 + $0x7] sm:$0xff]  ;;  %v1390_v42 = vld [vmem:[#allocation2 + $0xf] sm:$0xff] }
  0xc2   : > { %3290 = vmatprep.mubr.msk.bf16.mxu0 %vm966_vm10, %v912_v38 }
  0xc3   : > { %3291 = vmatmul.mubr.msk.bf16.gmra.mrb[4].mxu0 %vm966_vm10, %v914_v44 }
  0xc4   : > { %v419_v43 = vpop.permute.xlu0 %418  ;;  %v421_v45 = vpop.permute.xlu1 %420 }
  0xc5   : > { %v797_v53 = vsel %vm787_vm2, %v3658_v40, %v419_v43  ;;  %v799_v59 = vsel %vm787_vm2, %v3696_v1, %v421_v45  ;;  %v1405_v45 = vpack.c.bf16 %v1390_v42, %v1389_v41 }
  0xc8   : > { %v507_v46 = vpop.permute.xlu0 %506  ;;  %v509_v47 = vpop.permute.xlu1 %508 }
  0xc9   : > { %v814_v54 = vsel %vm804_vm3, %v797_v53, %v507_v46  ;;  %v816_v61 = vsel %vm804_vm3, %v799_v59, %v509_v47  ;;  %v3490_v46 = vld [vmem:[%s4411_s3 + $0xf0] sm:$0xff]   ;;  %v3494_v59 = vld [vmem:[%s4411_s3 + $0x140] sm:$0xff]  }
  0xca   : > { %3071 = vmatprep.subr.bf16.mxu0 %v3490_v46  ;;  %v3511_v46 = vld [vmem:[%s4411_s3 + $0x198] sm:$0xff]  }
  0xcc   : > { %v563_v6 = vpop.permute.xlu0 %562  ;;  %v565_v48 = vpop.permute.xlu1 %564 }
  0xcd   : > { %v831_v55 = vsel %vm821_vm4, %v814_v54, %v563_v6  ;;  %v833_v63 = vsel %vm821_vm4, %v816_v61, %v565_v48  ;;  %v3496_v61 = vld [vmem:[%s4411_s3 + $0x148] sm:$0xff]  }
  0xd0   : > { %v619_v7 = vpop.permute.xlu0 %618  ;;  %v621_v49 = vpop.permute.xlu1 %620 }
  0xd1   : > { %v848_v58 = vsel %vm838_vm5, %v831_v55, %v619_v7  ;;  %v850_v3 = vsel %vm838_vm5, %v833_v63, %v621_v49  ;;  %v3559_v7 = vmov 0.0|0.0   ;;  %v3491_v49 = vld [vmem:[%s4411_s3 + $0xb0] sm:$0xff]   ;;  %v3498_v63 = vld [vmem:[%s4411_s3 + $0x1c0] sm:$0xff]  }
  0xd2   : > { %2094 = vmatprep.mubr.bf16.mxu1 %v3559_v7  ;;  %3072 = vmatpush3.bf16.msra.mxu0 %v3491_v49 }
  0xd4   : > { %v706_v50 = vpop.permute.xlu0 %705  ;;  %v708_v51 = vpop.permute.xlu1 %707 }
  0xd5   : > { %v865_v60 = vsel %vm855_vm6, %v848_v58, %v706_v50  ;;  %v867_v5 = vsel %vm855_vm6, %v850_v3, %v708_v51  ;;  %v3505_v3 = vld [vmem:[%s4411_s3 + $0x118] sm:$0xff]  }
  0xd8   : > { %v727_v52 = vpop.permute.xlu0 %726  ;;  %v729_v56 = vpop.permute.xlu1 %728 }
  0xd9   : > { %v882_v62 = vsel %vm872_vm7, %v865_v60, %v727_v52  ;;  %v884_v1 = vsel %vm872_vm7, %v867_v5, %v729_v56  ;;  %v3492_v52 = vld [vmem:[%s4411_s3 + $0xf8] sm:$0xff]   ;;  %v3495_v60 = vld [vmem:[%s4411_s3 + $0x100] sm:$0xff]  }
  0xda   : > { %3073 = vmatprep.subr.bf16.mxu0 %v3492_v52  ;;  %v3509_v5 = vld [vmem:[%s4411_s3 + $0x120] sm:$0xff]  }
  0xdc   : > { %v748_v57 = vpop.permute.xlu0 %747  ;;  %v750_v0 = vpop.permute.xlu1 %749 }
  0xdd   : > { %v899_v40 = vsel %vm889_vm8, %v882_v62, %v748_v57  ;;  %v901_v8 = vsel %vm889_vm8, %v884_v1, %v750_v0  ;;  %v3493_v57 = vld [vmem:[%s4411_s3 + $0xb8] sm:$0xff]   ;;  %v3497_v62 = vld [vmem:[%s4411_s3 + $0x108] sm:$0xff]   ;;  %v3501_v0 = vld [vmem:[%s4411_s3 + $0x110] sm:$0xff]  }
  0xde   : > { %3074 = vmatpush3.bf16.msra.mxu0 %v3493_v57  ;;  %v3512_v1 = vld [vmem:[%s4411_s3 + $0x168] sm:$0xff]  }
  0xdf   : > { %3187 = vmatprep.subr.bf16.mxu0 %v3498_v63 }
  0xe0   : > { %v780_v2 = vpop.permute.xlu0 %779  ;;  %v782_v9 = vpop.permute.xlu1 %781 }
  0xe1   : > { %v916_v4 = vsel %vm906_vm9, %v899_v40, %v780_v2  ;;  %v918_v12 = vsel %vm906_vm9, %v901_v8, %v782_v9  ;;  %v3500_v40 = vld [vmem:[%s4411_s3 + $0x150] sm:$0xff]   ;;  %v3504_v2 = vld [vmem:[%s4411_s3 + $0x158] sm:$0xff]   ;;  %v3513_v8 = vld [vmem:[%s4411_s3 + $0x128] sm:$0xff]  }
  0xe2   : > { %3294 = vmatprep.mubr.msk.bf16.mxu0 %vm966_vm10, %v916_v4  ;;  %v3508_v4 = vld [vmem:[%s4411_s3 + $0x160] sm:$0xff]   ;;  %v3516_v9 = vld [vmem:[%s4411_s3 + $0x170] sm:$0xff]  }
  0xe3   : > { %3295 = vmatmul.mubr.msk.bf16.gmra.mrb[8].mxu0 %vm966_vm10, %v918_v12  ;;  %v3520_v12 = vld [vmem:[%s4411_s3 + $0x178] sm:$0xff]  }
  0xe4   : > { %v423_v11 = vpop.permute.xlu0 %422  ;;  %v425_v13 = vpop.permute.xlu1 %424 }
  0xe5   : > { %v801_v28 = vsel %vm787_vm2, %v3712_v10, %v423_v11  ;;  %v3488_v10 = vld [vmem:[%s4411_s3 + $0x38] sm:$0xff]   ;;  %v803_v38 = vsel %vm787_vm2, %v3741_v35, %v425_v13  ;;  %v3517_v11 = vld [vmem:[%s4411_s3 + $0x130] sm:$0xff]  }
  0xe6   : > { %3010 = vmatpush3.bf16.msra.mxu1 %v3488_v10  ;;  %v3521_v13 = vld [vmem:[%s4411_s3 + $0x138] sm:$0xff]   ;;  %v3499_v10 = vld [vmem:[%s4411_s3 + $0x180] sm:$0xff]  }
  0xe7   : > { %3123 = vmatprep.subr.bf16.mxu1 %v3494_v59  ;;  %v3523_v59 = vld [vmem:[%s4411_s3 + $0x1b0] sm:$0xff]  }
  0xe8   : > { %v511_v15 = vpop.permute.xlu0 %510  ;;  %v513_v16 = vpop.permute.xlu1 %512 }
  0xe9   : > { %v818_v30 = vsel %vm804_vm3, %v801_v28, %v511_v15  ;;  %v820_v43 = vsel %vm804_vm3, %v803_v38, %v513_v16  ;;  %2095 = vmatmul.mubr.bf16.vlgmr.msra.gmra.mrb[0].mxu1 %v1405_v45  ;;  %v4036_v15 = vld [vmem:[%s4411_s3 + $0x200] sm:$0xff]   ;;  %v3510_v45 = vld [vmem:[%s4411_s3 + $0x1d8] sm:$0xff]  }
  0xea   : > { %3124 = vmatpush3.bf16.msra.mxu1 %v3495_v60  ;;  %v4042_v16 = vld [vmem:[%s4410_s2] ss:$0 sm:$0xff]  ;;  %v3525_v60 = vld [vmem:[%s4411_s3 + $0x1f8] sm:$0xff]  }
  0xeb   : > { %3125 = vmatprep.subr.bf16.mxu1 %v3496_v61  ;;  %v3526_v61 = vld [vmem:[%s4411_s3 + $0x1b8] sm:$0xff]  }
  0xec   : > { %v567_v17 = vpop.permute.xlu0 %566  ;;  %v569_v18 = vpop.permute.xlu1 %568 }
  0xed   : > { %v835_v32 = vsel %vm821_vm4, %v818_v30, %v567_v17  ;;  %v837_v35 = vsel %vm821_vm4, %v820_v43, %v569_v18  ;;  %v3507_v43 = vld [vmem:[%s4411_s3 + $0x190] sm:$0xff]  }
  0xee   : > { %3126 = vmatpush3.bf16.msra.mxu1 %v3497_v62 }
  0xef   : > { %3127 = vmatprep.subr.bf16.mxu1 %v3500_v40 }
  0xf0   : > { %v623_v19 = vpop.permute.xlu0 %622  ;;  %v625_v20 = vpop.permute.xlu1 %624 }
  0xf1   : > { %v852_v36 = vsel %vm838_vm5, %v835_v32, %v623_v19  ;;  %v854_v50 = vsel %vm838_vm5, %v837_v35, %v625_v20  ;;  %v3514_v35 = vld [vmem:[%s4411_s3 + $0x1e0] sm:$0xff]  }
  0xf2   : > { %3128 = vmatpush3.bf16.msra.mxu1 %v3501_v0 }
  0xf3   : > { %3129 = vmatprep.subr.bf16.mxu1 %v3504_v2 }
  0xf4   : > { %v710_v21 = vpop.permute.xlu0 %709  ;;  %v712_v24 = vpop.permute.xlu1 %711 }
  0xf5   : > { %v869_v39 = vsel %vm855_vm6, %v852_v36, %v710_v21  ;;  %v871_v53 = vsel %vm855_vm6, %v854_v50, %v712_v24 }
  0xf6   : > { %3130 = vmatpush3.bf16.msra.mxu1 %v3505_v3 }
  0xf7   : > { %3131 = vmatprep.subr.bf16.mxu1 %v3508_v4 }
  0xf8   : > { %v731_v25 = vpop.permute.xlu0 %730  ;;  %v733_v14 = vpop.permute.xlu1 %732 }
  0xf9   : > { %v886_v44 = vsel %vm872_vm7, %v869_v39, %v731_v25  ;;  %v888_v54 = vsel %vm872_vm7, %v871_v53, %v733_v14  ;;  %v3503_v39 = vld [vmem:[%s4411_s3 + $0x188] sm:$0xff]  }
  0xfa   : > { %3132 = vmatpush3.bf16.msra.mxu1 %v3509_v5  ;;  %v3519_v53 = vld [vmem:[%s4411_s3 + $0x1a8] sm:$0xff]  }
  0xfb   : > { %3133 = vmatprep.subr.bf16.mxu1 %v3512_v1 }
  0xfc   : > { %v752_v33 = vpop.permute.xlu0 %751  ;;  %v754_v6 = vpop.permute.xlu1 %753 }
  0xfd   : > { %v903_v47 = vsel %vm889_vm8, %v886_v44, %v752_v33  ;;  %v905_v55 = vsel %vm889_vm8, %v888_v54, %v754_v6  ;;  %v3518_v6 = vld [vmem:[%s4411_s3 + $0x1e8] sm:$0xff]  }
  0xfe   : > { %3134 = vmatpush3.bf16.msra.mxu1 %v3513_v8 }
  0xff   : > { %3135 = vmatprep.subr.bf16.mxu1 %v3516_v9 }
 0x100   : > { %v784_v48 = vpop.permute.xlu0 %783  ;;  %v786_v56 = vpop.permute.xlu1 %785 }
 0x101   : > { %v920_v51 = vsel %vm906_vm9, %v903_v47, %v784_v48  ;;  %v922_v58 = vsel %vm906_vm9, %v905_v55, %v786_v56  ;;  %v3515_v47 = vld [vmem:[%s4411_s3 + $0x1a0] sm:$0xff]   ;;  %v3522_v56 = vld [vmem:[%s4411_s3 + $0x1f0] sm:$0xff]  }
 0x102   : > { %3298 = vmatprep.mubr.msk.bf16.mxu0 %vm966_vm10, %v920_v51  ;;  %3136 = vmatpush3.bf16.msra.mxu1 %v3517_v11 }
 0x103   : > { %3299 = vmatmul.mubr.msk.bf16.gmra.mrb[12].mxu0 %vm966_vm10, %v922_v58  ;;  %3137 = vmatprep.subr.bf16.mxu1 %v3520_v12 }
 0x106   : > { %3138 = vmatpush3.bf16.msra.mxu1 %v3521_v13 }
 0x107   : > { %3352 = vmatprep.subr.bf16.mxu1 %v4036_v15 }
 0x176   : > { %v3288_v17 = vpop.f32.mrb[0].mxu0 }
 0x177   : > { %v1030_v18 = vadd.f32 %v3288_v17, %v4042_v16  ;;  %v1021_v19 = vpop.f32.mrb[1].mxu0 }
 0x178   : > { %v1022_v20 = vadd.f32 %v4042_v16, %v1021_v19  ;;  %v3289_v21 = vpop.f32.mrb[2].mxu0 }
 0x179   : > { %v1086_v22 = vmax.f32 %v1030_v18, 0.0  ;;  %v1024_v24 = vpop.f32.mrb[3].mxu0 }
 0x17a   : > { %v1084_v25 = vmax.f32 %v1022_v20, 0.0 }
 0x17b   : > { %1375 = vst [vmem:[#allocation2 + $0x28] sm:$0xff] %v1086_v22  ;;  %v4054_v36 = vpack.c.bf16 %v3558_v23, %v1086_v22 }
 0x17c   : > { %1373 = vst [vmem:[#allocation2 + $0x18] sm:$0xff] %v1084_v25  ;;  %v4047_v26 = vpack.c.bf16 %v3558_v23, %v1084_v25 }
 0x17e   : > { %2102 = vmatprep.mubr.bf16.mxu1 %v4047_v26 }
 0x182   : > { %v1393_v28 = vld [vmem:[#allocation2 + $0x27] sm:$0xff]  ;;  %v1394_v29 = vld [vmem:[#allocation2 + $0x2f] sm:$0xff] }
 0x183   : > { %v1391_v30 = vld [vmem:[#allocation2 + $0x17] sm:$0xff]  ;;  %v1392_v31 = vld [vmem:[#allocation2 + $0x1f] sm:$0xff]  ;;  %v4059_v38 = vpack.c.bf16 %v1394_v29, %v1393_v28  ;;  %v1441_v62 = vld [vmem:[#allocation2 + $0x29] sm:$0xff] }
 0x184   : > { %v1438_v32 = vld [vmem:[#allocation2 + $0x11] sm:$0xff]  ;;  %v1406_v14 = vpack.c.bf16 %v1392_v31, %v1391_v30  ;;  %v1439_v41 = vld [vmem:[#allocation2 + $0x19] sm:$0xff]  ;;  %v1440_v42 = vld [vmem:[#allocation2 + $0x21] sm:$0xff] }
 0x185   : > { %v1453_v33 = vpack.c.bf16 %v1438_v32, %v1437_v27  ;;  %v4072_v44 = vpack.c.bf16 %v1440_v42, %v1439_v41 }
 0x186   : > { %2191 = vmatprep.mubr.bf16.mxu0 %v1406_v14  ;;  %2103 = vmatmul.mubr.bf16.gmra.mrb[4].mxu1 %v1406_v14 }
 0x187   : > { %2192 = vmatmul.mubr.bf16.vlgmr.msra.gmra.mrb[16].mxu0 %v1453_v33  ;;  %2110 = vmatprep.mubr.bf16.mxu1 %v4054_v36 }
 0x188   : > { %2199 = vmatprep.mubr.bf16.mxu0 %v4059_v38  ;;  %3188 = vmatpush3.bf16.msra.mxu0 %v3499_v10 }
 0x189   : > { %3189 = vmatprep.subr.bf16.mxu0 %v3502_v37 }
 0x18c   : > { %3190 = vmatpush3.bf16.msra.mxu0 %v3503_v39 }
 0x18d   : > { %3191 = vmatprep.subr.bf16.mxu0 %v3506_v34 }
 0x18e   : > { %2111 = vmatmul.mubr.bf16.gmra.mrb[8].mxu1 %v4059_v38 }
 0x18f   : > { %2200 = vmatmul.mubr.bf16.gmra.mrb[20].mxu0 %v4072_v44 }
 0x190   : > { %3192 = vmatpush3.bf16.msra.mxu0 %v3507_v43 }
 0x191   : > { %3193 = vmatprep.subr.bf16.mxu0 %v3510_v45 }
 0x194   : > { %3194 = vmatpush3.bf16.msra.mxu0 %v3511_v46 }
 0x195   : > { %3195 = vmatprep.subr.bf16.mxu0 %v3514_v35 }
 0x196   : > { %v3292_v48 = vpop.f32.mrb[4].mxu0 }
 0x197   : > { %v1046_v49 = vadd.f32 %v3292_v48, %v4042_v16  ;;  %v1037_v50 = vpop.f32.mrb[5].mxu0 }
 0x198   : > { %v1038_v51 = vadd.f32 %v4042_v16, %v1037_v50  ;;  %v3293_v52 = vpop.f32.mrb[6].mxu0  ;;  %3196 = vmatpush3.bf16.msra.mxu0 %v3515_v47 }
 0x199   : > { %v1090_v54 = vmax.f32 %v1046_v49, 0.0  ;;  %v1040_v55 = vpop.f32.mrb[7].mxu0  ;;  %3197 = vmatprep.subr.bf16.mxu0 %v3518_v6 }
 0x19a   : > { %v1088_v57 = vmax.f32 %v1038_v51, 0.0 }
 0x19b   : > { %1379 = vst [vmem:[#allocation2 + $0x48] sm:$0xff] %v1090_v54  ;;  %v4117_v1 = vpack.c.bf16 %v3558_v23, %v1090_v54 }
 0x19c   : > { %1377 = vst [vmem:[#allocation2 + $0x38] sm:$0xff] %v1088_v57  ;;  %v4100_v58 = vpack.c.bf16 %v3558_v23, %v1088_v57  ;;  %3198 = vmatpush3.bf16.msra.mxu0 %v3519_v53 }
 0x19d   : > { %3199 = vmatprep.subr.bf16.mxu0 %v3522_v56 }
 0x19e   : > { %2118 = vmatprep.mubr.bf16.mxu1 %v4100_v58 }
 0x1a0   : > { %3200 = vmatpush3.bf16.msra.mxu0 %v3523_v59 }
 0x1a1   : > { %3201 = vmatprep.subr.bf16.mxu0 %v3525_v60 }
 0x1a2   : > { %v1397_v63 = vld [vmem:[#allocation2 + $0x47] sm:$0xff]  ;;  %v1398_v40 = vld [vmem:[#allocation2 + $0x4f] sm:$0xff] }
 0x1a3   : > { %v1395_v0 = vld [vmem:[#allocation2 + $0x37] sm:$0xff]  ;;  %v1396_v2 = vld [vmem:[#allocation2 + $0x3f] sm:$0xff]  ;;  %v4122_v8 = vpack.c.bf16 %v1398_v40, %v1397_v63  ;;  %v1445_v27 = vld [vmem:[#allocation2 + $0x49] sm:$0xff] }
 0x1a4   : > { %v1442_v3 = vld [vmem:[#allocation2 + $0x31] sm:$0xff]  ;;  %v4112_v4 = vpack.c.bf16 %v1396_v2, %v1395_v0  ;;  %3202 = vmatpush3.bf16.msra.mxu0 %v3526_v61  ;;  %v1443_v9 = vld [vmem:[#allocation2 + $0x39] sm:$0xff]  ;;  %v1444_v11 = vld [vmem:[#allocation2 + $0x41] sm:$0xff] }
 0x1a5   : > { %v4114_v5 = vpack.c.bf16 %v1442_v3, %v1441_v62  ;;  %3302 = vmatprep.subr.bf16.mxu0 %v4036_v15  ;;  %v4127_v12 = vpack.c.bf16 %v1444_v11, %v1443_v9  ;;  %v3527_v9 = vld [vmem:[%s4411_s3 + $0x208] sm:$0xff]   ;;  %v3530_v11 = vld [vmem:[%s4411_s3 + $0x220] sm:$0xff]  }
 0x1a6   : > { %2207 = vmatprep.mubr.bf16.mxu0 %v4112_v4  ;;  %2119 = vmatmul.mubr.bf16.gmra.mrb[12].mxu1 %v4112_v4 }
 0x1a7   : > { %2208 = vmatmul.mubr.bf16.gmra.mrb[24].mxu0 %v4114_v5  ;;  %2126 = vmatprep.mubr.bf16.mxu1 %v4117_v1 }
 0x1a8   : > { %2215 = vmatprep.mubr.bf16.mxu0 %v4122_v8 }
 0x1ae   : > { %2127 = vmatmul.mubr.bf16.gmra.mrb[16].mxu1 %v4122_v8 }
 0x1af   : > { %2216 = vmatmul.mubr.bf16.gmra.mrb[28].mxu0 %v4127_v12 }
 0x1b6   : > { %v3296_v13 = vpop.f32.mrb[8].mxu0 }
 0x1b7   : > { %v1062_v17 = vadd.f32 %v3296_v13, %v4042_v16  ;;  %v1053_v18 = vpop.f32.mrb[9].mxu0 }
 0x1b8   : > { %v1054_v19 = vadd.f32 %v4042_v16, %v1053_v18  ;;  %v3297_v20 = vpop.f32.mrb[10].mxu0  ;;  %v1477_v18 = vld [vmem:[#allocation2 + $0xa1] sm:$0xff] }
 0x1b9   : > { %v1094_v21 = vmax.f32 %v1062_v17, 0.0  ;;  %v1056_v22 = vpop.f32.mrb[11].mxu0  ;;  %v1476_v17 = vld [vmem:[#allocation2 + $0x99] sm:$0xff] }
 0x1ba   : > { %v1092_v24 = vmax.f32 %v1054_v19, 0.0  ;;  %v1470_v19 = vld [vmem:[#allocation2 + $0x97] sm:$0xff]  ;;  %v1471_v20 = vld [vmem:[#allocation2 + $0x9f] sm:$0xff] }
 0x1bb   : > { %1383 = vst [vmem:[#allocation2 + $0x68] sm:$0xff] %v1094_v21  ;;  %v4142_v10 = vpack.c.bf16 %v3558_v23, %v1094_v21  ;;  %v1478_v21 = vpack.c.bf16 %v1477_v18, %v1476_v17 }
 0x1bc   : > { %1381 = vst [vmem:[#allocation2 + $0x58] sm:$0xff] %v1092_v24  ;;  %v4134_v25 = vpack.c.bf16 %v3558_v23, %v1092_v24  ;;  %v3011_v42 = vpop.f32.mrb[0].mxu1  ;;  %v3534_v24 = vld [vmem:[%s3609_s26 + $0xd8] sm:$0xff]  }
 0x1bd   : > { %v3012_v43 = vpop.f32.mrb[1].mxu1 }
 0x1be   : > { %2134 = vmatprep.mubr.bf16.mxu1 %v4134_v25  ;;  %v4155_v45 = vadd.f32 %v3012_v43, %v3011_v42  ;;  %v3014_v46 = vpop.f32.mrb[2].mxu1 }
 0x1bf   : > { %v3015_v35 = vpop.f32.mrb[3].mxu1 }
 0x1c0   : > { %v4157_v47 = vadd.f32 %v3015_v35, %v3014_v46 }
 0x1c2   : > { %v1401_v28 = vld [vmem:[#allocation2 + $0x67] sm:$0xff]  ;;  %v1402_v29 = vld [vmem:[#allocation2 + $0x6f] sm:$0xff] }
 0x1c3   : > { %v1399_v30 = vld [vmem:[#allocation2 + $0x57] sm:$0xff]  ;;  %v1400_v31 = vld [vmem:[#allocation2 + $0x5f] sm:$0xff]  ;;  %v4146_v37 = vpack.c.bf16 %v1402_v29, %v1401_v28  ;;  %v1449_v56 = vld [vmem:[#allocation2 + $0x69] sm:$0xff] }
 0x1c4   : > { %v1446_v32 = vld [vmem:[#allocation2 + $0x51] sm:$0xff]  ;;  %v4137_v14 = vpack.c.bf16 %v1400_v31, %v1399_v30  ;;  %v1447_v39 = vld [vmem:[#allocation2 + $0x59] sm:$0xff]  ;;  %v1448_v34 = vld [vmem:[#allocation2 + $0x61] sm:$0xff] }
 0x1c5   : > { %v4139_v33 = vpack.c.bf16 %v1446_v32, %v1445_v27  ;;  %v4151_v41 = vpack.c.bf16 %v1448_v34, %v1447_v39  ;;  %v3537_v27 = vld [vmem:[%s3609_s26 + $0xf0] sm:$0xff]   ;;  %v3538_v28 = vld [vmem:[%s3609_s26 + $0xf8] sm:$0xff]   ;;  %v3540_v29 = vld [vmem:[%s3609_s26 + $0x108] sm:$0xff]  }
 0x1c6   : > { %2223 = vmatprep.mubr.bf16.mxu0 %v4137_v14  ;;  %2135 = vmatmul.mubr.bf16.gmra.mrb[20].mxu1 %v4137_v14  ;;  %v4267_v30 = vld [vmem:[%s4412_s4] ss:$0 sm:$0xff] }
 0x1c7   : > { %2224 = vmatmul.mubr.bf16.gmra.mrb[32].mxu0 %v4139_v33  ;;  %2142 = vmatprep.mubr.bf16.mxu1 %v4142_v10  ;;  %v2097_v32 = vadd.f32 %v4155_v45, %v4267_v30  ;;  %v2100_v34 = vadd.f32 %v4157_v47, %v4267_v30 }
 0x1c8   : > { %2231 = vmatprep.mubr.bf16.mxu0 %v4146_v37 }
 0x1ce   : > { %2143 = vmatmul.mubr.bf16.gmra.mrb[24].mxu1 %v4146_v37 }
 0x1cf   : > { %2232 = vmatmul.mubr.bf16.gmra.mrb[36].mxu0 %v4151_v41 }
 0x1d6   : > { %v3300_v6 = vpop.f32.mrb[12].mxu0 }
 0x1d7   : > { %v4160_v48 = vadd.f32 %v3300_v6, %v4042_v16  ;;  %v1069_v49 = vpop.f32.mrb[13].mxu0 }
 0x1d8   : > { %v1070_v50 = vadd.f32 %v4042_v16, %v1069_v49  ;;  %v3301_v51 = vpop.f32.mrb[14].mxu0 }
 0x1d9   : > { %v1098_v52 = vmax.f32 %v4160_v48, 0.0  ;;  %v1072_v53 = vpop.f32.mrb[15].mxu0 }
 0x1da   : > { %v1096_v54 = vmax.f32 %v1070_v50, 0.0 }
 0x1db   : > { %1387 = vst [vmem:[#allocation2 + $0x88] sm:$0xff] %v1098_v52  ;;  %v1466_v13 = vpack.c.bf16 %v3558_v23, %v1098_v52 }
 0x1dc   : > { %1385 = vst [vmem:[#allocation2 + $0x78] sm:$0xff] %v1096_v54  ;;  %v4167_v55 = vpack.c.bf16 %v3558_v23, %v1096_v54  ;;  %v1472_v23 = vpack.c.bf16 %v1471_v20, %v1470_v19 }
 0x1de   : > { %2150 = vmatprep.mubr.bf16.mxu1 %v4167_v55 }
 0x1e2   : > { %v1461_v57 = vld [vmem:[#allocation2 + $0x87] sm:$0xff]  ;;  %v1462_v59 = vld [vmem:[#allocation2 + $0x8f] sm:$0xff] }
 0x1e3   : > { %v1403_v60 = vld [vmem:[#allocation2 + $0x77] sm:$0xff]  ;;  %v1404_v61 = vld [vmem:[#allocation2 + $0x7f] sm:$0xff]  ;;  %v4176_v40 = vpack.c.bf16 %v1462_v59, %v1461_v57 }
 0x1e4   : > { %v1450_v16 = vld [vmem:[#allocation2 + $0x71] sm:$0xff]  ;;  %v4170_v62 = vpack.c.bf16 %v1404_v61, %v1403_v60  ;;  %v1451_v0 = vld [vmem:[#allocation2 + $0x79] sm:$0xff]  ;;  %v1452_v2 = vld [vmem:[#allocation2 + $0x81] sm:$0xff] }
 0x1e5   : > { %v4172_v63 = vpack.c.bf16 %v1450_v16, %v1449_v56  ;;  %v4181_v3 = vpack.c.bf16 %v1452_v2, %v1451_v0 }
 0x1e6   : > { %2239 = vmatprep.mubr.bf16.mxu0 %v4170_v62  ;;  %2151 = vmatmul.mubr.bf16.gmra.mrb[28].mxu1 %v4170_v62 }
 0x1e7   : > { %2240 = vmatmul.mubr.bf16.gmra.mrb[40].mxu0 %v4172_v63  ;;  %2288 = vmatprep.mubr.bf16.mxu1 %v4072_v44  ;;  %v3528_v44 = vld [vmem:[%s4411_s3 + $0x210] sm:$0xff]  }
 0x1e8   : > { %2247 = vmatprep.mubr.bf16.mxu0 %v4176_v40 }
 0x1ee   : > { %2289 = vmatmul.mubr.bf16.vlgmr.msra.gmra.mrb[32].mxu1 %v4047_v26  ;;  %v3529_v26 = vld [vmem:[%s4411_s3 + $0x218] sm:$0xff]  }
 0x1ef   : > { %2248 = vmatmul.mubr.bf16.gmra.mrb[44].mxu0 %v4181_v3  ;;  %3360 = vmatpush3.bf16.msra.mxu1 %v4036_v15 }
 0x1f0   : > { %2296 = vmatprep.mubr.bf16.mxu1 %v4114_v5  ;;  %2385 = vmatprep.mubr.bf16.mxu0 %v4054_v36 }
 0x1f1   : > { %3353 = vmatprep.subr.bf16.mxu1 %v3527_v9 }
 0x1f3   : > { %3361 = vmatpush3.bf16.msra.mxu1 %v3527_v9 }
 0x1f4   : > { %3354 = vmatprep.subr.bf16.mxu1 %v3528_v44 }
 0x1f6   : > { %2297 = vmatmul.mubr.bf16.gmra.mrb[36].mxu1 %v4054_v36  ;;  %v3531_v36 = vld [vmem:[%s4411_s3 + $0x228] sm:$0xff]  }
 0x1f7   : > { %2386 = vmatmul.mubr.bf16.vlgmr.msra.gmra.mrb[48].mxu0 %v4059_v38  ;;  %2304 = vmatprep.mubr.bf16.mxu1 %v4127_v12  ;;  %v3533_v38 = vld [vmem:[%s4411_s3 + $0x238] sm:$0xff]  }
 0x1f8   : > { %2393 = vmatprep.mubr.bf16.mxu0 %v4100_v58  ;;  %3303 = vmatpush3.bf16.msra.mxu0 %v4036_v15  ;;  %v3532_v15 = vld [vmem:[%s4411_s3 + $0x230] sm:$0xff]  }
 0x1f9   : > { %3362 = vmatpush3.bf16.msra.mxu1 %v3528_v44  ;;  %3304 = vmatprep.subr.bf16.mxu0 %v3527_v9 }
 0x1fa   : > { %3355 = vmatprep.subr.bf16.mxu1 %v3529_v26 }
 0x1fc   : > { %3305 = vmatpush3.bf16.msra.mxu0 %v3527_v9 }
 0x1fd   : > { %3363 = vmatpush3.bf16.msra.mxu1 %v3529_v26  ;;  %3306 = vmatprep.subr.bf16.mxu0 %v3528_v44 }
 0x1fe   : > { %2305 = vmatmul.mubr.bf16.gmra.mrb[40].mxu1 %v4100_v58  ;;  %3356 = vmatprep.subr.bf16.mxu1 %v3530_v11  ;;  %v2563_v58 = vld [vmem:[%s4413_s5] sm:$0xf] }
 0x1ff   : > { %2394 = vmatmul.mubr.bf16.gmra.mrb[52].mxu0 %v4112_v4  ;;  %2312 = vmatprep.mubr.bf16.mxu1 %v4139_v33  ;;  %v1467_v4 = vld [vmem:[#allocation2 + $0x89] sm:$0xff]  ;;  %v2629_v22 = vsel %vm983_vm1, %v2563_v58, 0 }
 0x200   : > { %2401 = vmatprep.mubr.bf16.mxu0 %v4117_v1  ;;  %3307 = vmatpush3.bf16.msra.mxu0 %v3528_v44 }
 0x201   : > { %3364 = vmatpush3.bf16.msra.mxu1 %v3530_v11  ;;  %3308 = vmatprep.subr.bf16.mxu0 %v3529_v26 }
 0x202   : > { %3357 = vmatprep.subr.bf16.mxu1 %v3531_v36 }
 0x204   : > { %3309 = vmatpush3.bf16.msra.mxu0 %v3529_v26 }
 0x205   : > { %3365 = vmatpush3.bf16.msra.mxu1 %v3531_v36  ;;  %3310 = vmatprep.subr.bf16.mxu0 %v3530_v11 }
 0x206   : > { %2313 = vmatmul.mubr.bf16.gmra.mrb[44].mxu1 %v4117_v1  ;;  %3358 = vmatprep.subr.bf16.mxu1 %v3532_v15  ;;  %v1468_v1 = vld [vmem:[#allocation2 + $0x91] sm:$0xff] }
 0x207   : > { %2402 = vmatmul.mubr.bf16.gmra.mrb[56].mxu0 %v4122_v8  ;;  %2320 = vmatprep.mubr.bf16.mxu1 %v4151_v41  ;;  %v1469_v8 = vpack.c.bf16 %v1468_v1, %v1467_v4 }
 0x208   : > { %2409 = vmatprep.mubr.bf16.mxu0 %v4134_v25  ;;  %3311 = vmatpush3.bf16.msra.mxu0 %v3530_v11 }
 0x209   : > { %3366 = vmatpush3.bf16.msra.mxu1 %v3532_v15  ;;  %3312 = vmatprep.subr.bf16.mxu0 %v3531_v36 }
 0x20a   : > { %3359 = vmatprep.subr.bf16.mxu1 %v3533_v38 }
 0x20c   : > { %3313 = vmatpush3.bf16.msra.mxu0 %v3531_v36 }
 0x20d   : > { %3367 = vmatpush3.bf16.msra.mxu1 %v3533_v38  ;;  %3314 = vmatprep.subr.bf16.mxu0 %v3532_v15 }
 0x20e   : > { %2321 = vmatmul.mubr.bf16.gmra.mrb[48].mxu1 %v4134_v25  ;;  %3401 = vmatprep.subr.msk.bf16.mxu1 %vm983_vm1, %v2563_v58  ;;  %v3535_v25 = vld [vmem:[%s3609_s26 + $0xe0] sm:$0xff]  }
 0x20f   : > { %2410 = vmatmul.mubr.bf16.gmra.mrb[60].mxu0 %v4137_v14  ;;  %2328 = vmatprep.mubr.bf16.mxu1 %v4172_v63 }
 0x210   : > { %2417 = vmatprep.mubr.bf16.mxu0 %v4142_v10  ;;  %3315 = vmatpush3.bf16.msra.mxu0 %v3532_v15 }
 0x211   : > { %3316 = vmatprep.subr.bf16.mxu0 %v3533_v38 }
 0x214   : > { %3317 = vmatpush3.bf16.msra.mxu0 %v3533_v38 }
 0x216   : > { %2329 = vmatmul.mubr.bf16.gmra.mrb[52].mxu1 %v4142_v10 }
 0x217   : > { %2418 = vmatmul.mubr.bf16.gmra.mrb[64].mxu0 %v4146_v37  ;;  %2336 = vmatprep.mubr.bf16.mxu1 %v4181_v3 }
 0x218   : > { %2425 = vmatprep.mubr.bf16.mxu0 %v4167_v55 }
 0x21e   : > { %2337 = vmatmul.mubr.bf16.gmra.mrb[56].mxu1 %v4167_v55 }
 0x21f   : > { %2426 = vmatmul.mubr.bf16.gmra.mrb[68].mxu0 %v4170_v62  ;;  %2344 = vmatprep.mubr.bf16.mxu1 %v1469_v8 }
 0x220   : > { %2433 = vmatprep.mubr.bf16.mxu0 %v1466_v13 }
 0x226   : > { %2345 = vmatmul.mubr.bf16.gmra.mrb[60].mxu1 %v1466_v13 }
 0x227   : > { %2434 = vmatmul.mubr.bf16.gmra.mrb[72].mxu0 %v4176_v40  ;;  %3330 = vmatprep.mubr.bf16.mxu1 %v1469_v8 }
 0x228   : > { %2441 = vmatprep.mubr.bf16.mxu0 %v3559_v7  ;;  %v3536_v7 = vld [vmem:[%s3609_s26 + $0xe8] sm:$0xff]  }
 0x22e   : > { %3331 = vmatmul.mubr.bf16.vlgmr.msra.gmra.mrb[64].mxu1 %v1478_v21 }
 0x22f   : > { %2442 = vmatmul.mubr.bf16.gmra.mrb[76].mxu0 %v1472_v23  ;;  %3335 = vmatpush3.bf16.msra.mxu1 %v2629_v22 }
 0x230   : > { %3318 = vmatprep.mubr.bf16.mxu0 %v4114_v5  ;;  %3336 = vmatprep.mubr.msk.bf16.mxu1 %vm787_vm2, %v3534_v24  ;;  %v3539_v5 = vld [vmem:[%s3609_s26 + $0x100] sm:$0xff]  }
 0x236   : > { %3337 = vmatmul.mubr.msk.bf16.vlgmr.msra.gmra.mrb[68].mxu1 %vm787_vm2, %v3535_v25 }
 0x237   : > { %3319 = vmatmul.mubr.bf16.vlgmr.msra.gmra.mrb[80].mxu0 %v4127_v12  ;;  %3340 = vmatprep.mubr.msk.bf16.mxu1 %vm787_vm2, %v3536_v7  ;;  %v3541_v12 = vld [vmem:[%s3609_s26 + $0x110] sm:$0xff]   ;;  %s2981_s26 = sshll.u32 %s4416_s22, 7 }
 0x238   : > { %3322 = vmatprep.mubr.bf16.mxu0 %v4139_v33  ;;  %s4374_s29 = scalar_lea.vmem %s4414_s6, %s2981_s26 }
 0x23e   : > { %3341 = vmatmul.mubr.msk.bf16.gmra.mrb[72].mxu1 %vm787_vm2, %v3537_v27 }
 0x23f   : > { %3323 = vmatmul.mubr.bf16.gmra.mrb[84].mxu0 %v4151_v41  ;;  %3344 = vmatprep.mubr.msk.bf16.mxu1 %vm787_vm2, %v3538_v28 }
 0x240   : > { %3326 = vmatprep.mubr.bf16.mxu0 %v4172_v63 }
 0x246   : > { %3345 = vmatmul.mubr.msk.bf16.gmra.mrb[76].mxu1 %vm787_vm2, %v3539_v5 }
 0x247   : > { %3327 = vmatmul.mubr.bf16.gmra.mrb[88].mxu0 %v4181_v3  ;;  %3348 = vmatprep.mubr.msk.bf16.mxu1 %vm787_vm2, %v3540_v29 }
 0x24e   : > { %3349 = vmatmul.mubr.msk.bf16.gmra.mrb[64].mxu1 %vm787_vm2, %v3541_v12 }
 0x259   : > { %v3017_v31 = vpop.f32.mrb[4].mxu1 }
 0x25a   : > { %v3075_v14 = vpop.f32.mrb[16].mxu0  ;;  %v3018_v33 = vpop.f32.mrb[5].mxu1 }
 0x25b   : > { %v3019_v10 = vadd.f32 %v3018_v33, %v3017_v31  ;;  %v3076_v37 = vpop.f32.mrb[17].mxu0  ;;  %v3020_v39 = vpop.f32.mrb[6].mxu1 }
 0x25c   : > { %v3077_v41 = vadd.f32 %v3076_v37, %v3075_v14  ;;  %v3078_v42 = vpop.f32.mrb[18].mxu0  ;;  %v3021_v43 = vpop.f32.mrb[7].mxu1 }
 0x25d   : > { %v3022_v46 = vadd.f32 %v3021_v43, %v3020_v39  ;;  %v3079_v35 = vpop.f32.mrb[19].mxu0  ;;  %v2105_v55 = vadd.f32 %v3019_v10, %v4267_v30 }
 0x25e   : > { %v4273_v6 = vadd.f32 %v3077_v41, %v2097_v32  ;;  %v3080_v48 = vadd.f32 %v3079_v35, %v3078_v42 }
 0x25f   : > { %v2108_v61 = vadd.f32 %v3022_v46, %v4267_v30 }
 0x260   : > { %v4275_v49 = vadd.f32 %v3080_v48, %v2100_v34 }
 0x261   : > { %v3023_v50 = vpop.f32.mrb[8].mxu1 }
 0x262   : > { %v3081_v45 = vpop.f32.mrb[20].mxu0  ;;  %v3024_v51 = vpop.f32.mrb[9].mxu1 }
 0x263   : > { %v3025_v52 = vadd.f32 %v3024_v51, %v3023_v50  ;;  %v3082_v53 = vpop.f32.mrb[21].mxu0  ;;  %v3026_v54 = vpop.f32.mrb[10].mxu1 }
 0x264   : > { %v3083_v56 = vadd.f32 %v3082_v53, %v3081_v45  ;;  %v3084_v47 = vpop.f32.mrb[22].mxu0  ;;  %v3027_v57 = vpop.f32.mrb[11].mxu1 }
 0x265   : > { %v3028_v59 = vadd.f32 %v3027_v57, %v3026_v54  ;;  %v3085_v60 = vpop.f32.mrb[23].mxu0  ;;  %v2113_v26 = vadd.f32 %v3025_v52, %v4267_v30 }
 0x266   : > { %v4279_v16 = vadd.f32 %v3083_v56, %v2105_v55  ;;  %v3086_v62 = vadd.f32 %v3085_v60, %v3084_v47 }
 0x267   : > { %v2116_v4 = vadd.f32 %v3028_v59, %v4267_v30 }
 0x268   : > { %v4281_v63 = vadd.f32 %v3086_v62, %v2108_v61 }
 0x279   : > { %v3029_v40 = vpop.f32.mrb[12].mxu1 }
 0x27a   : > { %v3087_v0 = vpop.f32.mrb[24].mxu0  ;;  %v3030_v2 = vpop.f32.mrb[13].mxu1 }
 0x27b   : > { %v3031_v3 = vadd.f32 %v3030_v2, %v3029_v40  ;;  %v3088_v9 = vpop.f32.mrb[25].mxu0  ;;  %v3032_v44 = vpop.f32.mrb[14].mxu1 }
 0x27c   : > { %v3089_v11 = vadd.f32 %v3088_v9, %v3087_v0  ;;  %v3090_v36 = vpop.f32.mrb[26].mxu0  ;;  %v3033_v15 = vpop.f32.mrb[15].mxu1 }
 0x27d   : > { %v3034_v38 = vadd.f32 %v3033_v15, %v3032_v44  ;;  %v3091_v58 = vpop.f32.mrb[27].mxu0  ;;  %v2121_v22 = vadd.f32 %v3031_v3, %v4267_v30 }
 0x27e   : > { %v4285_v1 = vadd.f32 %v3089_v11, %v2113_v26  ;;  %v3092_v8 = vadd.f32 %v3091_v58, %v3090_v36 }
 0x27f   : > { %v2124_v5 = vadd.f32 %v3034_v38, %v4267_v30 }
 0x280   : > { %v4287_v13 = vadd.f32 %v3092_v8, %v2116_v4 }
 0x281   : > { %v3035_v17 = vpop.f32.mrb[16].mxu1 }
 0x282   : > { %v3093_v18 = vpop.f32.mrb[28].mxu0  ;;  %v3036_v19 = vpop.f32.mrb[17].mxu1 }
 0x283   : > { %v3037_v20 = vadd.f32 %v3036_v19, %v3035_v17  ;;  %v3094_v21 = vpop.f32.mrb[29].mxu0  ;;  %v3038_v23 = vpop.f32.mrb[18].mxu1 }
 0x284   : > { %v3095_v24 = vadd.f32 %v3094_v21, %v3093_v18  ;;  %v3096_v25 = vpop.f32.mrb[30].mxu0  ;;  %v3039_v7 = vpop.f32.mrb[19].mxu1 }
 0x285   : > { %v3040_v27 = vadd.f32 %v3039_v7, %v3038_v23  ;;  %v3097_v28 = vpop.f32.mrb[31].mxu0  ;;  %v2129_v34 = vadd.f32 %v3037_v20, %v4267_v30 }
 0x286   : > { %v4291_v29 = vadd.f32 %v3095_v24, %v2121_v22  ;;  %v3098_v12 = vadd.f32 %v3097_v28, %v3096_v25 }
 0x287   : > { %v2132_v48 = vadd.f32 %v3040_v27, %v4267_v30 }
 0x288   : > { %v4293_v31 = vadd.f32 %v3098_v12, %v2124_v5 }
 0x299   : > { %v3041_v32 = vpop.f32.mrb[20].mxu1 }
 0x29a   : > { %v3099_v14 = vpop.f32.mrb[32].mxu0  ;;  %v3042_v33 = vpop.f32.mrb[21].mxu1 }
 0x29b   : > { %v3043_v10 = vadd.f32 %v3042_v33, %v3041_v32  ;;  %v3100_v37 = vpop.f32.mrb[33].mxu0  ;;  %v3044_v39 = vpop.f32.mrb[22].mxu1 }
 0x29c   : > { %v3101_v41 = vadd.f32 %v3100_v37, %v3099_v14  ;;  %v3102_v42 = vpop.f32.mrb[34].mxu0  ;;  %v3045_v43 = vpop.f32.mrb[23].mxu1 }
 0x29d   : > { %v3046_v46 = vadd.f32 %v3045_v43, %v3044_v39  ;;  %v3103_v35 = vpop.f32.mrb[35].mxu0  ;;  %v2137_v57 = vadd.f32 %v3043_v10, %v4267_v30 }
 0x29e   : > { %v4297_v50 = vadd.f32 %v3101_v41, %v2129_v34  ;;  %v3104_v45 = vadd.f32 %v3103_v35, %v3102_v42 }
 0x29f   : > { %v2140_v0 = vadd.f32 %v3046_v46, %v4267_v30 }
 0x2a0   : > { %v4299_v51 = vadd.f32 %v3104_v45, %v2132_v48 }
 0x2a1   : > { %v3047_v52 = vpop.f32.mrb[24].mxu1 }
 0x2a2   : > { %v3105_v53 = vpop.f32.mrb[36].mxu0  ;;  %v3048_v54 = vpop.f32.mrb[25].mxu1 }
 0x2a3   : > { %v3049_v55 = vadd.f32 %v3048_v54, %v3047_v52  ;;  %v3106_v56 = vpop.f32.mrb[37].mxu0  ;;  %v3050_v47 = vpop.f32.mrb[26].mxu1 }
 0x2a4   : > { %v3107_v59 = vadd.f32 %v3106_v56, %v3105_v53  ;;  %v3108_v60 = vpop.f32.mrb[38].mxu0  ;;  %v3051_v61 = vpop.f32.mrb[27].mxu1 }
 0x2a5   : > { %v3052_v62 = vadd.f32 %v3051_v61, %v3050_v47  ;;  %v3109_v40 = vpop.f32.mrb[39].mxu0  ;;  %v2145_v58 = vadd.f32 %v3049_v55, %v4267_v30 }
 0x2a6   : > { %v4303_v2 = vadd.f32 %v3107_v59, %v2137_v57  ;;  %v3110_v3 = vadd.f32 %v3109_v40, %v3108_v60 }
 0x2a7   : > { %v2148_v20 = vadd.f32 %v3052_v62, %v4267_v30 }
 0x2a8   : > { %v4305_v9 = vadd.f32 %v3110_v3, %v2140_v0 }
 0x2b9   : > { %v3053_v44 = vpop.f32.mrb[28].mxu1 }
 0x2ba   : > { %v3111_v26 = vpop.f32.mrb[40].mxu0  ;;  %v3054_v11 = vpop.f32.mrb[29].mxu1 }
 0x2bb   : > { %v3055_v36 = vadd.f32 %v3054_v11, %v3053_v44  ;;  %v3112_v15 = vpop.f32.mrb[41].mxu0  ;;  %v3056_v38 = vpop.f32.mrb[30].mxu1 }
 0x2bc   : > { %v3113_v4 = vadd.f32 %v3112_v15, %v3111_v26  ;;  %v3114_v8 = vpop.f32.mrb[42].mxu0  ;;  %v3057_v17 = vpop.f32.mrb[31].mxu1 }
 0x2bd   : > { %v3058_v18 = vadd.f32 %v3057_v17, %v3056_v38  ;;  %v3115_v19 = vpop.f32.mrb[43].mxu0  ;;  %v2153_v12 = vadd.f32 %v3055_v36, %v4267_v30 }
 0x2be   : > { %v4309_v21 = vadd.f32 %v3113_v4, %v2145_v58  ;;  %v3116_v23 = vadd.f32 %v3115_v19, %v3114_v8 }
 0x2bf   : > { %v2156_v34 = vadd.f32 %v3058_v18, %v4267_v30 }
 0x2c0   : > { %v4311_v22 = vadd.f32 %v3116_v23, %v2148_v20 }
 0x2c1   : > { %v3139_v24 = vpop.f32.mrb[32].mxu1 }
 0x2c2   : > { %v3117_v25 = vpop.f32.mrb[44].mxu0  ;;  %v3140_v7 = vpop.f32.mrb[33].mxu1 }
 0x2c3   : > { %v3118_v27 = vpop.f32.mrb[45].mxu0  ;;  %v3141_v28 = vadd.f32 %v3140_v7, %v3139_v24  ;;  %v3142_v5 = vpop.f32.mrb[34].mxu1 }
 0x2c4   : > { %v3119_v32 = vadd.f32 %v3118_v27, %v3117_v25  ;;  %v3120_v14 = vpop.f32.mrb[46].mxu0  ;;  %v3143_v33 = vpop.f32.mrb[35].mxu1 }
 0x2c5   : > { %v2291_v10 = vadd.f32 %v3141_v28, %v4273_v6  ;;  %v3121_v37 = vpop.f32.mrb[47].mxu0  ;;  %v3144_v39 = vadd.f32 %v3143_v33, %v3142_v5 }
 0x2c6   : > { %v4316_v41 = vadd.f32 %v3119_v32, %v2153_v12  ;;  %v3122_v42 = vadd.f32 %v3121_v37, %v3120_v14 }
 0x2c7   : > { %v2294_v43 = vadd.f32 %v3144_v39, %v4275_v49 }
 0x2c8   : > { %v4319_v46 = vadd.f32 %v3122_v42, %v2156_v34 }
 0x2c9   : > { %v3145_v35 = vpop.f32.mrb[36].mxu1 }
 0x2ca   : > { %v3203_v48 = vpop.f32.mrb[48].mxu0  ;;  %v3146_v45 = vpop.f32.mrb[37].mxu1 }
 0x2cb   : > { %v3147_v52 = vadd.f32 %v3146_v45, %v3145_v35  ;;  %v3204_v53 = vpop.f32.mrb[49].mxu0  ;;  %v3148_v54 = vpop.f32.mrb[38].mxu1 }
 0x2cc   : > { %v3205_v55 = vadd.f32 %v3204_v53, %v3203_v48  ;;  %v3206_v56 = vpop.f32.mrb[50].mxu0  ;;  %v3149_v6 = vpop.f32.mrb[39].mxu1 }
 0x2cd   : > { %v2299_v47 = vadd.f32 %v3147_v52, %v4279_v16  ;;  %v3150_v57 = vadd.f32 %v3149_v6, %v3148_v54  ;;  %v3207_v30 = vpop.f32.mrb[51].mxu0 }
 0x2ce   : > { %v3208_v59 = vadd.f32 %v3207_v30, %v3206_v56  ;;  %v4322_v60 = vadd.f32 %v3205_v55, %v2291_v10 }
 0x2cf   : > { %v2302_v49 = vadd.f32 %v3150_v57, %v4281_v63 }
 0x2d0   : > { %v4325_v61 = vadd.f32 %v3208_v59, %v2294_v43 }
 0x2d1   : > { %v3151_v62 = vpop.f32.mrb[40].mxu1 }
 0x2d2   : > { %v3209_v40 = vpop.f32.mrb[52].mxu0  ;;  %v3152_v0 = vpop.f32.mrb[41].mxu1 }
 0x2d3   : > { %v3153_v3 = vadd.f32 %v3152_v0, %v3151_v62  ;;  %v3210_v44 = vpop.f32.mrb[53].mxu0  ;;  %v3154_v26 = vpop.f32.mrb[42].mxu1 }
 0x2d4   : > { %v3211_v11 = vadd.f32 %v3210_v44, %v3209_v40  ;;  %v3212_v36 = vpop.f32.mrb[54].mxu0  ;;  %v3155_v15 = vpop.f32.mrb[43].mxu1 }
 0x2d5   : > { %v2307_v16 = vadd.f32 %v3153_v3, %v4285_v1  ;;  %v3156_v38 = vadd.f32 %v3155_v15, %v3154_v26  ;;  %v3213_v58 = vpop.f32.mrb[55].mxu0 }
 0x2d6   : > { %v3214_v4 = vadd.f32 %v3213_v58, %v3212_v36  ;;  %v4328_v8 = vadd.f32 %v3211_v11, %v2299_v47 }
 0x2d7   : > { %v2310_v63 = vadd.f32 %v3156_v38, %v4287_v13 }
 0x2d8   : > { %v4331_v17 = vadd.f32 %v3214_v4, %v2302_v49 }
 0x2d9   : > { %v3157_v18 = vpop.f32.mrb[44].mxu1 }
 0x2da   : > { %v3215_v19 = vpop.f32.mrb[56].mxu0  ;;  %v3158_v20 = vpop.f32.mrb[45].mxu1 }
 0x2db   : > { %v3159_v23 = vadd.f32 %v3158_v20, %v3157_v18  ;;  %v3216_v24 = vpop.f32.mrb[57].mxu0  ;;  %v3160_v25 = vpop.f32.mrb[46].mxu1 }
 0x2dc   : > { %v3217_v7 = vadd.f32 %v3216_v24, %v3215_v19  ;;  %v3218_v27 = vpop.f32.mrb[58].mxu0  ;;  %v3161_v28 = vpop.f32.mrb[47].mxu1 }
 0x2dd   : > { %v2315_v1 = vadd.f32 %v3159_v23, %v4291_v29  ;;  %v3162_v5 = vadd.f32 %v3161_v28, %v3160_v25  ;;  %v3219_v12 = vpop.f32.mrb[59].mxu0 }
 0x2de   : > { %v3220_v32 = vadd.f32 %v3219_v12, %v3218_v27  ;;  %v4334_v14 = vadd.f32 %v3217_v7, %v2307_v16 }
 0x2df   : > { %v2318_v13 = vadd.f32 %v3162_v5, %v4293_v31 }
 0x2e0   : > { %v4337_v33 = vadd.f32 %v3220_v32, %v2310_v63 }
 0x2e1   : > { %v3163_v10 = vpop.f32.mrb[48].mxu1 }
 0x2e2   : > { %v3221_v37 = vpop.f32.mrb[60].mxu0  ;;  %v3164_v39 = vpop.f32.mrb[49].mxu1 }
 0x2e3   : > { %v3165_v34 = vadd.f32 %v3164_v39, %v3163_v10  ;;  %v3222_v42 = vpop.f32.mrb[61].mxu0  ;;  %v3166_v43 = vpop.f32.mrb[50].mxu1 }
 0x2e4   : > { %v3223_v35 = vadd.f32 %v3222_v42, %v3221_v37  ;;  %v3224_v48 = vpop.f32.mrb[62].mxu0  ;;  %v3167_v45 = vpop.f32.mrb[51].mxu1 }
 0x2e5   : > { %v2323_v29 = vadd.f32 %v3165_v34, %v4297_v50  ;;  %v3168_v52 = vadd.f32 %v3167_v45, %v3166_v43  ;;  %v3225_v53 = vpop.f32.mrb[63].mxu0 }
 0x2e6   : > { %v3226_v54 = vadd.f32 %v3225_v53, %v3224_v48  ;;  %v4340_v55 = vadd.f32 %v3223_v35, %v2315_v1 }
 0x2e7   : > { %v2326_v31 = vadd.f32 %v3168_v52, %v4299_v51 }
 0x2e8   : > { %v4343_v56 = vadd.f32 %v3226_v54, %v2318_v13 }
 0x2e9   : > { %v3169_v6 = vpop.f32.mrb[52].mxu1 }
 0x2ea   : > { %v3227_v47 = vpop.f32.mrb[64].mxu0  ;;  %v3170_v57 = vpop.f32.mrb[53].mxu1 }
 0x2eb   : > { %v3171_v30 = vadd.f32 %v3170_v57, %v3169_v6  ;;  %v3228_v59 = vpop.f32.mrb[65].mxu0  ;;  %v3172_v49 = vpop.f32.mrb[54].mxu1 }
 0x2ec   : > { %v3229_v62 = vadd.f32 %v3228_v59, %v3227_v47  ;;  %v3230_v40 = vpop.f32.mrb[66].mxu0  ;;  %v3173_v0 = vpop.f32.mrb[55].mxu1 }
 0x2ed   : > { %v2331_v50 = vadd.f32 %v3171_v30, %v4303_v2  ;;  %v3174_v3 = vadd.f32 %v3173_v0, %v3172_v49  ;;  %v3231_v44 = vpop.f32.mrb[67].mxu0 }
 0x2ee   : > { %v3232_v26 = vadd.f32 %v3231_v44, %v3230_v40  ;;  %v4346_v11 = vadd.f32 %v3229_v62, %v2323_v29 }
 0x2ef   : > { %v2334_v51 = vadd.f32 %v3174_v3, %v4305_v9 }
 0x2f0   : > { %v4349_v36 = vadd.f32 %v3232_v26, %v2326_v31 }
 0x2f1   : > { %v3175_v15 = vpop.f32.mrb[56].mxu1 }
 0x2f2   : > { %v3233_v16 = vpop.f32.mrb[68].mxu0  ;;  %v3176_v38 = vpop.f32.mrb[57].mxu1 }
 0x2f3   : > { %v3177_v58 = vadd.f32 %v3176_v38, %v3175_v15  ;;  %v3234_v4 = vpop.f32.mrb[69].mxu0  ;;  %v3178_v63 = vpop.f32.mrb[58].mxu1 }
 0x2f4   : > { %v3235_v18 = vadd.f32 %v3234_v4, %v3233_v16  ;;  %v3236_v19 = vpop.f32.mrb[70].mxu0  ;;  %v3179_v20 = vpop.f32.mrb[59].mxu1 }
 0x2f5   : > { %v2339_v2 = vadd.f32 %v3177_v58, %v4309_v21  ;;  %v3180_v23 = vadd.f32 %v3179_v20, %v3178_v63  ;;  %v3237_v24 = vpop.f32.mrb[71].mxu0 }
 0x2f6   : > { %v3238_v25 = vadd.f32 %v3237_v24, %v3236_v19  ;;  %v4352_v7 = vadd.f32 %v3235_v18, %v2331_v50 }
 0x2f7   : > { %v2342_v9 = vadd.f32 %v3180_v23, %v4311_v22 }
 0x2f8   : > { %v4355_v27 = vadd.f32 %v3238_v25, %v2334_v51 }
 0x2f9   : > { %v3181_v28 = vpop.f32.mrb[60].mxu1 }
 0x2fa   : > { %v3239_v1 = vpop.f32.mrb[72].mxu0  ;;  %v3182_v5 = vpop.f32.mrb[61].mxu1 }
 0x2fb   : > { %v3183_v12 = vadd.f32 %v3182_v5, %v3181_v28  ;;  %v3240_v32 = vpop.f32.mrb[73].mxu0  ;;  %v3184_v13 = vpop.f32.mrb[62].mxu1 }
 0x2fc   : > { %v3241_v10 = vadd.f32 %v3240_v32, %v3239_v1  ;;  %v3242_v37 = vpop.f32.mrb[74].mxu0  ;;  %v3185_v39 = vpop.f32.mrb[63].mxu1 }
 0x2fd   : > { %v2347_v21 = vadd.f32 %v3183_v12, %v4316_v41  ;;  %v3186_v34 = vadd.f32 %v3185_v39, %v3184_v13  ;;  %v3243_v42 = vpop.f32.mrb[75].mxu0 }
 0x2fe   : > { %v3244_v43 = vadd.f32 %v3243_v42, %v3242_v37  ;;  %v4358_v35 = vadd.f32 %v3241_v10, %v2339_v2 }
 0x2ff   : > { %v2350_v22 = vadd.f32 %v3186_v34, %v4319_v46 }
 0x300   : > { %v4361_v48 = vadd.f32 %v3244_v43, %v2342_v9 }
 0x302   : > { %v3245_v45 = vpop.f32.mrb[76].mxu0 }
 0x303   : > { %v3246_v29 = vpop.f32.mrb[77].mxu0 }
 0x304   : > { %v3247_v52 = vadd.f32 %v3246_v29, %v3245_v45  ;;  %v3248_v53 = vpop.f32.mrb[78].mxu0 }
 0x305   : > { %v3249_v54 = vpop.f32.mrb[79].mxu0 }
 0x306   : > { %v3250_v31 = vadd.f32 %v3249_v54, %v3248_v53  ;;  %v4363_v6 = vadd.f32 %v3247_v52, %v2347_v21 }
 0x308   : > { %v4365_v47 = vadd.f32 %v3250_v31, %v2350_v22 }
 0x309   : > { %v3338_v41 = vpop.f32.mrb[68].mxu1 }
 0x30a   : > { %v3320_v57 = vpop.f32.mrb[80].mxu0  ;;  %v2665_v30 = vpop.f32.mrb[69].mxu1 }
 0x30b   : > { %v2493_v59 = vadd.f32 %v3320_v57, %v4328_v8  ;;  %v2484_v49 = vpop.f32.mrb[81].mxu0  ;;  %v3339_v46 = vpop.f32.mrb[70].mxu1 }
 0x30c   : > { %v2485_v62 = vadd.f32 %v2484_v49, %v4322_v60  ;;  %v3321_v40 = vpop.f32.mrb[82].mxu0  ;;  %v2668_v0 = vpop.f32.mrb[71].mxu1 }
 0x30d   : > { %v2730_v50 = vadd.f32 %v3338_v41, %v2493_v59  ;;  %v2496_v3 = vadd.f32 %v3321_v40, %v4331_v17  ;;  %v2487_v44 = vpop.f32.mrb[83].mxu0 }
 0x30e   : > { %v2728_v8 = vadd.f32 %v2665_v30, %v2485_v62  ;;  %v2488_v26 = vadd.f32 %v2487_v44, %v4325_v61 }
 0x30f   : > { %v2746_v51 = vmax.f32 %v2730_v50, 0.0  ;;  %v2731_v60 = vadd.f32 %v3339_v46, %v2496_v3 }
 0x310   : > { %v2744_v15 = vmax.f32 %v2728_v8, 0.0  ;;  %v2729_v16 = vadd.f32 %v2668_v0, %v2488_v26 }
 0x311   : > { %2762 = vst [vmem:[%s4374_s29 + $0x10] sm:$0xff] %v2746_v51  ;;  %v2747_v38 = vmax.f32 %v2731_v60, 0.0  ;;  %v3342_v17 = vpop.f32.mrb[72].mxu1 }
 0x312   : > { %2760 = vst [vmem:[%s4374_s29] sm:$0xff] %v2744_v15  ;;  %v2745_v58 = vmax.f32 %v2729_v16, 0.0  ;;  %v3324_v4 = vpop.f32.mrb[84].mxu0  ;;  %v2681_v63 = vpop.f32.mrb[73].mxu1 }
 0x313   : > { %2763 = vst [vmem:[%s4374_s29 + $0x18] sm:$0xff] %v2747_v38  ;;  %v2509_v18 = vadd.f32 %v3324_v4, %v4340_v55  ;;  %v2500_v19 = vpop.f32.mrb[85].mxu0  ;;  %v3343_v20 = vpop.f32.mrb[74].mxu1 }
 0x314   : > { %2761 = vst [vmem:[%s4374_s29 + $0x8] sm:$0xff] %v2745_v58  ;;  %v2501_v61 = vadd.f32 %v2500_v19, %v4334_v14  ;;  %v3325_v2 = vpop.f32.mrb[86].mxu0  ;;  %v2684_v23 = vpop.f32.mrb[75].mxu1 }
 0x315   : > { %v2734_v24 = vadd.f32 %v3342_v17, %v2509_v18  ;;  %v2512_v25 = vadd.f32 %v3325_v2, %v4343_v56  ;;  %v2503_v9 = vpop.f32.mrb[87].mxu0 }
 0x316   : > { %v2732_v28 = vadd.f32 %v2681_v63, %v2501_v61  ;;  %v2504_v1 = vadd.f32 %v2503_v9, %v4337_v33 }
 0x317   : > { %v2750_v5 = vmax.f32 %v2734_v24, 0.0  ;;  %v2735_v55 = vadd.f32 %v3343_v20, %v2512_v25 }
 0x318   : > { %v2748_v12 = vmax.f32 %v2732_v28, 0.0  ;;  %v2733_v32 = vadd.f32 %v2684_v23, %v2504_v1 }
 0x319   : > { %2766 = vst [vmem:[%s4374_s29 + $0x30] sm:$0xff] %v2750_v5  ;;  %v2751_v13 = vmax.f32 %v2735_v55, 0.0  ;;  %v3346_v10 = vpop.f32.mrb[76].mxu1 }
 0x31a   : > { %2764 = vst [vmem:[%s4374_s29 + $0x20] sm:$0xff] %v2748_v12  ;;  %v2749_v14 = vmax.f32 %v2733_v32, 0.0  ;;  %v3328_v37 = vpop.f32.mrb[88].mxu0  ;;  %v2697_v39 = vpop.f32.mrb[77].mxu1 }
 0x31b   : > { %2767 = vst [vmem:[%s4374_s29 + $0x38] sm:$0xff] %v2751_v13  ;;  %v2525_v21 = vadd.f32 %v3328_v37, %v4352_v7  ;;  %v2516_v56 = vpop.f32.mrb[89].mxu0  ;;  %v3347_v34 = vpop.f32.mrb[78].mxu1 }
 0x31c   : > { %2765 = vst [vmem:[%s4374_s29 + $0x28] sm:$0xff] %v2749_v14  ;;  %v2517_v33 = vadd.f32 %v2516_v56, %v4346_v11  ;;  %v3329_v42 = vpop.f32.mrb[90].mxu0  ;;  %v2700_v43 = vpop.f32.mrb[79].mxu1 }
 0x31d   : > { %v2738_v22 = vadd.f32 %v3346_v10, %v2525_v21  ;;  %v2528_v45 = vadd.f32 %v3329_v42, %v4355_v27  ;;  %v2519_v29 = vpop.f32.mrb[91].mxu0 }
 0x31e   : > { %v2736_v52 = vadd.f32 %v2697_v39, %v2517_v33  ;;  %v2520_v53 = vadd.f32 %v2519_v29, %v4349_v36 }
 0x31f   : > { %v2754_v54 = vmax.f32 %v2738_v22, 0.0  ;;  %v2739_v7 = vadd.f32 %v3347_v34, %v2528_v45 }
 0x320   : > { %v2752_v31 = vmax.f32 %v2736_v52, 0.0  ;;  %v2737_v41 = vadd.f32 %v2700_v43, %v2520_v53 }
 0x321   : > { %2770 = vst [vmem:[%s4374_s29 + $0x50] sm:$0xff] %v2754_v54  ;;  %v2755_v57 = vmax.f32 %v2739_v7, 0.0  ;;  %v3350_v30 = vpop.f32.mrb[64].mxu1 }
 0x322   : > { %2768 = vst [vmem:[%s4374_s29 + $0x40] sm:$0xff] %v2752_v31  ;;  %v2753_v11 = vmax.f32 %v2737_v41, 0.0  ;;  %v3392_v59 = vadd.f32 %v3350_v30, %v4363_v6  ;;  %v2713_v27 = vpop.f32.mrb[65].mxu1 }
 0x323   : > { %2771 = vst [vmem:[%s4374_s29 + $0x58] sm:$0xff] %v2755_v57  ;;  %v3393_v49 = vadd.f32 %v2713_v27, %v4358_v35  ;;  %v3351_v36 = vpop.f32.mrb[66].mxu1 }
 0x324   : > { %2769 = vst [vmem:[%s4374_s29 + $0x48] sm:$0xff] %v2753_v11  ;;  %v2758_v46 = vmax.f32 %v3392_v59, 0.0  ;;  %v3394_v62 = vadd.f32 %v3351_v36, %v4365_v47  ;;  %v2716_v40 = vpop.f32.mrb[67].mxu1 }
 0x325   : > { %v2756_v0 = vmax.f32 %v3393_v49, 0.0  ;;  %v3395_v50 = vadd.f32 %v2716_v40, %v4361_v48 }
 0x326   : > { %2774 = vst [vmem:[%s4374_s29 + $0x70] sm:$0xff] %v2758_v46  ;;  %v2759_v3 = vmax.f32 %v3394_v62, 0.0 }
 0x327   : > { %2772 = vst [vmem:[%s4374_s29 + $0x60] sm:$0xff] %v2756_v0  ;;  %v2757_v44 = vmax.f32 %v3395_v50, 0.0 }
 0x328   : > { %2775 = vst [vmem:[%s4374_s29 + $0x78] sm:$0xff] %v2759_v3 }
 0x329   : > { %2773 = vst [vmem:[%s4374_s29 + $0x68] sm:$0xff] %v2757_v44 }
 0x32a PF: > { %s16_s21 = sadd.s32 1, %s3548_s21  }
 0x32b   : > { %p13_p4 = scmp.ge.s32.totalorder %s16_s21, 4  }
 0x32d   :  { %15 = sbr.rel (!%p13_p4) target bundleno = 1 (0x1), region = 74 }

</bundles_post_ra>
